<compile_context>
chip_gen: v6e
topology: v6e:2x2x1
jax: 0.10.0
libtpu: 0.0.40
codegen_flags: <defaults>
</compile_context>

<pallas_src>
import functools

import jax
import jax.numpy as jnp
import numpy as np
from jax import lax
from jax.experimental import pallas as pl
from jax.experimental.pallas import tpu as pltpu


# ----------------------------------------------------------------------------
# helpers
# ----------------------------------------------------------------------------
def _pick_tile(n, target, align):
    """Largest tile <= target that divides n and is a multiple of `align`;
    falls back to the full extent n (always legal as a full-dim block)."""
    if n <= target:
        return n
    t = (min(target, n) // align) * align
    while t >= align:
        if n % t == 0:
            return t
        t -= align
    return n


def _vmem_limit_bytes():
    """Per-generation VMEM budget (leave headroom for Mosaic internal scratch):
    ~48 MiB on v7x (64 MiB physical), ~96 MiB on v5e/v6e (128 MiB physical)."""
    cap = 64 * 1024 * 1024
    try:
        cap = int(pltpu.get_tpu_info().vmem_capacity_bytes)
    except Exception:
        pass
    return max(32 * 1024 * 1024, min(cap * 3 // 4, 96 * 1024 * 1024))


# ----------------------------------------------------------------------------
# pass 1: LayerNorm + QKV projection (once per token)
# ----------------------------------------------------------------------------
def _qkv_kernel(x_ref, wq_ref, wk_ref, wv_ref, bq_ref, bk_ref, bv_ref,
                q_out, k_out, v_out, *, heads, eps, compute_dtype):
    # LayerNorm core (affine folded into the weights/bias on the wrapper side).
    xf = x_ref[0].astype(jnp.float32)                       # (TN, D)
    mean = jnp.mean(xf, axis=-1, keepdims=True)
    xc = xf - mean
    var = jnp.mean(xc * xc, axis=-1, keepdims=True)
    z = (xc * lax.rsqrt(var + eps)).astype(compute_dtype)   # (TN, D) bf16

    # Head-major projections; scale folded into Wq, gamma folded into all,
    # beta contributes the f32 bias.  Done once per token tile.
    for h in range(heads):
        q_out[0, h] = (jnp.dot(z, wq_ref[h], preferred_element_type=jnp.float32)
                       + bq_ref[h]).astype(q_out.dtype)
        k_out[0, h] = (jnp.dot(z, wk_ref[h], preferred_element_type=jnp.float32)
                       + bk_ref[h]).astype(k_out.dtype)
        v_out[0, h] = (jnp.dot(z, wv_ref[h], preferred_element_type=jnp.float32)
                       + bv_ref[h]).astype(v_out.dtype)


# ----------------------------------------------------------------------------
# pass 2: flash attention + output projection
# ----------------------------------------------------------------------------
def _flash_kernel(q_ref, k_ref, v_ref, alibi_ref, wo_ref, bo_ref, o_ref,
                  m_sc, l_sc, acc_sc, *, heads, compute_dtype):
    ki = pl.program_id(2)
    nk = pl.num_programs(2)

    @pl.when(ki == 0)
    def _init():
        m_sc[...] = jnp.full(m_sc.shape, -jnp.inf, jnp.float32)
        l_sc[...] = jnp.zeros(l_sc.shape, jnp.float32)
        acc_sc[...] = jnp.zeros(acc_sc.shape, jnp.float32)

    q = q_ref[0]                                            # (H, TQ, dh) bf16
    k = k_ref[0]                                            # (H, TK, dh) bf16
    v = v_ref[0]                                            # (H, TK, dh) bf16

    # scores for all heads at once (scale already folded into Wq).
    s = jnp.einsum('hqd,hkd->hqk', q, k,
                   preferred_element_type=jnp.float32)      # (H, TQ, TK)
    s = s + alibi_ref[0].astype(jnp.float32)

    # online (flash) softmax update; statistics kept in f32.
    m_prev = m_sc[...]
    m_new = jnp.maximum(m_prev, jnp.max(s, axis=-1, keepdims=True))
    alpha = jnp.exp(m_prev - m_new)
    p = jnp.exp(s - m_new)
    l_sc[...] = alpha * l_sc[...] + jnp.sum(p, axis=-1, keepdims=True)
    acc_sc[...] = alpha * acc_sc[...] + jnp.einsum(
        'hqk,hkd->hqd', p.astype(compute_dtype), v,
        preferred_element_type=jnp.float32)
    m_sc[...] = m_new

    # last KV step: normalize + fold the output projection as a sum of
    # per-head (TQ, dh) @ (dh, D) matmuls (lane-dense final store).
    @pl.when(ki == nk - 1)
    def _finalize():
        inv_l = pl.reciprocal(l_sc[...], approx=True)       # (H, TQ, 1)
        y = jnp.dot((acc_sc[0] * inv_l[0]).astype(compute_dtype), wo_ref[0],
                    preferred_element_type=jnp.float32)
        for h in range(1, heads):
            y = y + jnp.dot((acc_sc[h] * inv_l[h]).astype(compute_dtype),
                            wo_ref[h], preferred_element_type=jnp.float32)
        o_ref[0] = (y + bo_ref[0]).astype(o_ref.dtype)


# ----------------------------------------------------------------------------
# wrapper
# ----------------------------------------------------------------------------
def attention_forward(x, alibi, gamma, beta, w_qkv, w_out, b_out, *,
                      heads, eps=1e-5, block_q=256, block_k=256, block_n=256,
                      compute_dtype=jnp.bfloat16):
    """Forward of the CROMA Attention module.

    block_q/block_k default to 256 (fills the 2x256x256 MXU on v6e/v7x); on
    v5e prefer block_k=128.  _pick_tile clamps to divisors of N.
    """
    B, N, D = x.shape
    assert D % heads == 0, "dim must be divisible by attention_heads"
    dh = D // heads
    scale = dh ** (-0.5)

    TQ = _pick_tile(N, block_q, 8)        # sublane-aligned query tile
    TK = _pick_tile(N, block_k, 128)      # lane-aligned KV tile (or full N)
    TN = _pick_tile(N, block_n, 8)        # token tile for the QKV pre-pass

    # ---- wrapper-side (free, O(D^2)) weight prep: head-major, pre-transposed,
    # softmax scale folded into Wq, LayerNorm gamma folded into all weights,
    # LayerNorm beta folded into an f32 bias.
    wq, wk, wv = jnp.split(w_qkv.astype(jnp.float32), 3, axis=0)   # (D, D) each

    def head_major(w):                                             # -> (H, D, dh)
        return jnp.transpose(w.reshape(heads, dh, D), (0, 2, 1))

    wq_h = head_major(wq) * scale
    wk_h = head_major(wk)
    wv_h = head_major(wv)
    beta32 = beta.astype(jnp.float32)
    bq = jnp.einsum('d,hde->he', beta32, wq_h)                     # (H, dh) f32
    bk = jnp.einsum('d,hde->he', beta32, wk_h)
    bv = jnp.einsum('d,hde->he', beta32, wv_h)
    g = gamma.astype(jnp.float32)[None, :, None]
    wq_h = (g * wq_h).astype(compute_dtype)
    wk_h = (g * wk_h).astype(compute_dtype)
    wv_h = (g * wv_h).astype(compute_dtype)

    wo_h = w_out.T.reshape(heads, dh, D).astype(compute_dtype)     # (H, dh, D)
    bo2 = b_out.reshape(1, D).astype(jnp.float32)

    vmem_limit = _vmem_limit_bytes()

    # ---------------- pass 1: QKV pre-pass ----------------
    qkv_kernel = functools.partial(_qkv_kernel, heads=heads, eps=eps,
                                   compute_dtype=compute_dtype)
    qkv_shape = jax.ShapeDtypeStruct((B, heads, N, dh), compute_dtype)
    const3 = pl.BlockSpec((heads, D, dh), lambda b, ni: (0, 0, 0))
    const_b = pl.BlockSpec((heads, dh), lambda b, ni: (0, 0))
    out_hm = pl.BlockSpec((1, heads, TN, dh), lambda b, ni: (b, 0, ni, 0))

    q_hm, k_hm, v_hm = pl.pallas_call(
        qkv_kernel,
        out_shape=(qkv_shape, qkv_shape, qkv_shape),
        grid_spec=pltpu.PrefetchScalarGridSpec(
            num_scalar_prefetch=0,
            grid=(B, N // TN),
            in_specs=[
                pl.BlockSpec((1, TN, D), lambda b, ni: (b, ni, 0)),   # x rows
                const3, const3, const3,                               # Wq/Wk/Wv
                const_b, const_b, const_b,                            # bq/bk/bv
            ],
            out_specs=[out_hm, out_hm, out_hm]),
        compiler_params=pltpu.CompilerParams(
            dimension_semantics=("parallel", "parallel"),
            vmem_limit_bytes=vmem_limit),
    )(x, wq_h, wk_h, wv_h, bq, bk, bv)

    # ---------------- pass 2: flash attention ----------------
    flash_kernel = functools.partial(_flash_kernel, heads=heads,
                                     compute_dtype=compute_dtype)
    out = pl.pallas_call(
        flash_kernel,
        out_shape=jax.ShapeDtypeStruct((B, N, D), x.dtype),
        grid_spec=pltpu.PrefetchScalarGridSpec(
            num_scalar_prefetch=0,
            grid=(B, N // TQ, N // TK),
            in_specs=[
                pl.BlockSpec((1, heads, TQ, dh),
                             lambda b, qi, ki: (b, 0, qi, 0)),        # Q (per qi)
                pl.BlockSpec((1, heads, TK, dh),
                             lambda b, qi, ki: (b, 0, ki, 0)),        # K tile
                pl.BlockSpec((1, heads, TK, dh),
                             lambda b, qi, ki: (b, 0, ki, 0)),        # V tile
                pl.BlockSpec((1, heads, TQ, TK),
                             lambda b, qi, ki: (b, 0, qi, ki)),       # alibi (native dtype)
                pl.BlockSpec((heads, dh, D), lambda b, qi, ki: (0, 0, 0)),  # Wo
                pl.BlockSpec((1, D), lambda b, qi, ki: (0, 0)),             # b_out
            ],
            out_specs=pl.BlockSpec((1, TQ, D), lambda b, qi, ki: (b, qi, 0)),
            scratch_shapes=[
                pltpu.VMEM((heads, TQ, 1), jnp.float32),    # running max m
                pltpu.VMEM((heads, TQ, 1), jnp.float32),    # running sum l
                pltpu.VMEM((heads, TQ, dh), jnp.float32),   # output accumulator
            ]),
        compiler_params=pltpu.CompilerParams(
            dimension_semantics=("parallel", "parallel", "arbitrary"),
            vmem_limit_bytes=vmem_limit),
    )(q_hm, k_hm, v_hm, alibi, wo_h, bo2)
    return out


# ----------------------------------------------------------------------------
# pure-JAX f32 reference (PyTorch module semantics)
# ----------------------------------------------------------------------------
def attention_reference(x, alibi, gamma, beta, w_qkv, w_out, b_out, *,
                        heads, eps=1e-5):
    B, N, D = x.shape
    dh = D // heads
    mean = jnp.mean(x, axis=-1, keepdims=True)
    var = jnp.mean((x - mean) ** 2, axis=-1, keepdims=True)
    xn = (x - mean) / jnp.sqrt(var + eps) * gamma + beta
    qkv = xn @ w_qkv.T                                   # (B, N, 3D)
    q, k, v = jnp.split(qkv, 3, axis=-1)

    def to_heads(t):
        return t.reshape(B, N, heads, dh).transpose(0, 2, 1, 3)   # (B,H,N,d)

    q, k, v = map(to_heads, (q, k, v))
    scores = jnp.einsum('bhid,bhjd->bhij', q, k) * (dh ** -0.5) + alibi
    attn = jax.nn.softmax(scores, axis=-1)
    out = jnp.einsum('bhij,bhjd->bhid', attn, v)
    out = out.transpose(0, 2, 1, 3).reshape(B, N, D)
    return out @ w_out.T + b_out


if __name__ == "__main__":
    def run_case(B, N, D, H, key, block_q=256, block_k=256):
        k1, k2, k3, k4, k5, k6, k7 = jax.random.split(key, 7)
        x = jax.random.normal(k1, (B, N, D), dtype=jnp.float32)
        alibi = 0.1 * jax.random.normal(k2, (B, H, N, N), dtype=jnp.float32)
        gamma = 1.0 + 0.1 * jax.random.normal(k6, (D,), dtype=jnp.float32)
        beta = 0.05 * jax.random.normal(k7, (D,), dtype=jnp.float32)
        w_qkv = 0.05 * jax.random.normal(k3, (3 * D, D), dtype=jnp.float32)
        w_out = 0.05 * jax.random.normal(k4, (D, D), dtype=jnp.float32)
        b_out = 0.01 * jax.random.normal(k5, (D,), dtype=jnp.float32)

        y = attention_forward(x, alibi, gamma, beta, w_qkv, w_out, b_out,
                              heads=H, block_q=block_q, block_k=block_k)
        y = jax.block_until_ready(y)

        y_ref = attention_reference(x, alibi, gamma, beta, w_qkv, w_out, b_out,
                                    heads=H)
        # bf16 MXU operands with f32 accumulation -> loose tolerance.
        np.testing.assert_allclose(np.asarray(y), np.asarray(y_ref),
                                   rtol=2e-2, atol=2e-2)

    key = jax.random.PRNGKey(0)
    k_small, k_flash = jax.random.split(key)

    # Small shapes (single KV step per query tile): B=2, seq=16, dim=32, H=8.
    run_case(B=2, N=16, D=32, H=8, key=k_small)
    # Exercises the flash path (grid = (1, 2, 2): 2 query tiles x 2 KV steps).
    run_case(B=1, N=256, D=32, H=4, key=k_flash, block_q=128, block_k=128)

    print("KERNEL_OK")
</pallas_src>

<mosaic_0001>
module attributes {stable_mosaic.version = 11 : i64} {
  func.func @_qkv_kernel(%arg0: i32, %arg1: i32, %arg2: memref<1x16x32xf32, #tpu.memory_space<vmem>>, %arg3: memref<8x32x4xbf16, #tpu.memory_space<vmem>>, %arg4: memref<8x32x4xbf16, #tpu.memory_space<vmem>>, %arg5: memref<8x32x4xbf16, #tpu.memory_space<vmem>>, %arg6: memref<8x4xf32, #tpu.memory_space<vmem>>, %arg7: memref<8x4xf32, #tpu.memory_space<vmem>>, %arg8: memref<8x4xf32, #tpu.memory_space<vmem>>, %arg9: memref<1x8x16x4xbf16, #tpu.memory_space<vmem>>, %arg10: memref<1x8x16x4xbf16, #tpu.memory_space<vmem>>, %arg11: memref<1x8x16x4xbf16, #tpu.memory_space<vmem>>) attributes {dimension_semantics = [#tpu.dimension_semantics<parallel>, #tpu.dimension_semantics<parallel>], iteration_bounds = array<i64: 2, 1>, scalar_prefetch = 0 : i64, scratch_operands = 0 : i64, tpu.core_type = #tpu.core_type<tc>, window_params = [{transform_indices = @transform_0, window_bounds = array<i64: 1, 16, 32>}, {pipeline_mode = #tpu.pipeline_mode<synchronous>, transform_indices = @transform_1, window_bounds = array<i64: 8, 32, 4>}, {pipeline_mode = #tpu.pipeline_mode<synchronous>, transform_indices = @transform_2, window_bounds = array<i64: 8, 32, 4>}, {pipeline_mode = #tpu.pipeline_mode<synchronous>, transform_indices = @transform_3, window_bounds = array<i64: 8, 32, 4>}, {pipeline_mode = #tpu.pipeline_mode<synchronous>, transform_indices = @transform_4, window_bounds = array<i64: 8, 4>}, {pipeline_mode = #tpu.pipeline_mode<synchronous>, transform_indices = @transform_5, window_bounds = array<i64: 8, 4>}, {pipeline_mode = #tpu.pipeline_mode<synchronous>, transform_indices = @transform_6, window_bounds = array<i64: 8, 4>}, {transform_indices = @transform_7, window_bounds = array<i64: 1, 8, 16, 4>}, {transform_indices = @transform_8, window_bounds = array<i64: 1, 8, 16, 4>}, {transform_indices = @transform_9, window_bounds = array<i64: 1, 8, 16, 4>}]} {
    %c0 = arith.constant 0 : index
    %c0_0 = arith.constant 0 : index
    %c0_1 = arith.constant 0 : index
    %0 = vector.load %arg2[%c0, %c0_0, %c0_1] : memref<1x16x32xf32, #tpu.memory_space<vmem>>, vector<1x16x32xf32>
    %1 = vector.shape_cast %0 : vector<1x16x32xf32> to vector<16x32xf32>
    %cst = arith.constant dense<0.000000e+00> : vector<16xf32>
    %2 = vector.multi_reduction <add>, %1, %cst [1] : vector<16x32xf32> to vector<16xf32>
    %3 = vector.shape_cast %2 : vector<16xf32> to vector<16x1xf32>
    %cst_2 = arith.constant 3.200000e+01 : f32
    %4 = vector.broadcast %cst_2 : f32 to vector<16x1xf32>
    %5 = arith.divf %3, %4 : vector<16x1xf32>
    %6 = vector.broadcast %5 : vector<16x1xf32> to vector<16x32xf32>
    %7 = arith.subf %1, %6 : vector<16x32xf32>
    %8 = arith.mulf %7, %7 : vector<16x32xf32>
    %cst_3 = arith.constant dense<0.000000e+00> : vector<16xf32>
    %9 = vector.multi_reduction <add>, %8, %cst_3 [1] : vector<16x32xf32> to vector<16xf32>
    %10 = vector.shape_cast %9 : vector<16xf32> to vector<16x1xf32>
    %cst_4 = arith.constant 3.200000e+01 : f32
    %11 = vector.broadcast %cst_4 : f32 to vector<16x1xf32>
    %12 = arith.divf %10, %11 : vector<16x1xf32>
    %cst_5 = arith.constant 9.99999974E-6 : f32
    %13 = vector.broadcast %cst_5 : f32 to vector<16x1xf32>
    %14 = arith.addf %12, %13 : vector<16x1xf32>
    %15 = math.rsqrt %14 : vector<16x1xf32>
    %16 = vector.broadcast %15 : vector<16x1xf32> to vector<16x32xf32>
    %17 = arith.mulf %7, %16 : vector<16x32xf32>
    %18 = arith.truncf %17 : vector<16x32xf32> to vector<16x32xbf16>
    %c0_6 = arith.constant 0 : index
    %c0_7 = arith.constant 0 : index
    %c0_8 = arith.constant 0 : index
    %19 = vector.load %arg3[%c0_6, %c0_7, %c0_8] : memref<8x32x4xbf16, #tpu.memory_space<vmem>>, vector<1x32x4xbf16>
    %20 = vector.shape_cast %19 : vector<1x32x4xbf16> to vector<32x4xbf16>
    %cst_9 = arith.constant dense<0.000000e+00> : vector<16x4xf32>
    %21 = tpu.matmul %18, %20, %cst_9 {dimension_numbers = #tpu.dot_dimension_numbers<[1], [0], [0], [1], [0, 0, 1, 1], [], []>} : vector<16x32xbf16>, vector<32x4xbf16>, vector<16x4xf32> -> vector<16x4xf32>
    %c0_10 = arith.constant 0 : index
    %c0_11 = arith.constant 0 : index
    %22 = vector.load %arg6[%c0_10, %c0_11] : memref<8x4xf32, #tpu.memory_space<vmem>>, vector<1x4xf32>
    %23 = vector.shape_cast %22 : vector<1x4xf32> to vector<4xf32>
    %24 = vector.shape_cast %23 : vector<4xf32> to vector<1x4xf32>
    %25 = vector.broadcast %24 : vector<1x4xf32> to vector<16x4xf32>
    %26 = arith.addf %21, %25 : vector<16x4xf32>
    %27 = arith.truncf %26 : vector<16x4xf32> to vector<16x4xbf16>
    %c0_12 = arith.constant 0 : index
    %c0_13 = arith.constant 0 : index
    %c0_14 = arith.constant 0 : index
    %c0_15 = arith.constant 0 : index
    %28 = vector.load %arg9[%c0_12, %c0_13, %c0_14, %c0_15] : memref<1x8x16x4xbf16, #tpu.memory_space<vmem>>, vector<1x1x16x4xbf16>
    %29 = vector.shape_cast %28 : vector<1x1x16x4xbf16> to vector<16x4xbf16>
    %30 = vector.shape_cast %27 : vector<16x4xbf16> to vector<1x1x16x4xbf16>
    tpu.vector_store %arg9[%c0_12, %c0_13, %c0_14, %c0_15], %30 {strides = array<i32>} : memref<1x8x16x4xbf16, #tpu.memory_space<vmem>>, vector<1x1x16x4xbf16>,
    %c0_16 = arith.constant 0 : index
    %c0_17 = arith.constant 0 : index
    %c0_18 = arith.constant 0 : index
    %31 = vector.load %arg4[%c0_16, %c0_17, %c0_18] : memref<8x32x4xbf16, #tpu.memory_space<vmem>>, vector<1x32x4xbf16>
    %32 = vector.shape_cast %31 : vector<1x32x4xbf16> to vector<32x4xbf16>
    %cst_19 = arith.constant dense<0.000000e+00> : vector<16x4xf32>
    %33 = tpu.matmul %18, %32, %cst_19 {dimension_numbers = #tpu.dot_dimension_numbers<[1], [0], [0], [1], [0, 0, 1, 1], [], []>} : vector<16x32xbf16>, vector<32x4xbf16>, vector<16x4xf32> -> vector<16x4xf32>
    %c0_20 = arith.constant 0 : index
    %c0_21 = arith.constant 0 : index
    %34 = vector.load %arg7[%c0_20, %c0_21] : memref<8x4xf32, #tpu.memory_space<vmem>>, vector<1x4xf32>
    %35 = vector.shape_cast %34 : vector<1x4xf32> to vector<4xf32>
    %36 = vector.shape_cast %35 : vector<4xf32> to vector<1x4xf32>
    %37 = vector.broadcast %36 : vector<1x4xf32> to vector<16x4xf32>
    %38 = arith.addf %33, %37 : vector<16x4xf32>
    %39 = arith.truncf %38 : vector<16x4xf32> to vector<16x4xbf16>
    %c0_22 = arith.constant 0 : index
    %c0_23 = arith.constant 0 : index
    %c0_24 = arith.constant 0 : index
    %c0_25 = arith.constant 0 : index
    %40 = vector.load %arg10[%c0_22, %c0_23, %c0_24, %c0_25] : memref<1x8x16x4xbf16, #tpu.memory_space<vmem>>, vector<1x1x16x4xbf16>
    %41 = vector.shape_cast %40 : vector<1x1x16x4xbf16> to vector<16x4xbf16>
    %42 = vector.shape_cast %39 : vector<16x4xbf16> to vector<1x1x16x4xbf16>
    tpu.vector_store %arg10[%c0_22, %c0_23, %c0_24, %c0_25], %42 {strides = array<i32>} : memref<1x8x16x4xbf16, #tpu.memory_space<vmem>>, vector<1x1x16x4xbf16>,
    %c0_26 = arith.constant 0 : index
    %c0_27 = arith.constant 0 : index
    %c0_28 = arith.constant 0 : index
    %43 = vector.load %arg5[%c0_26, %c0_27, %c0_28] : memref<8x32x4xbf16, #tpu.memory_space<vmem>>, vector<1x32x4xbf16>
    %44 = vector.shape_cast %43 : vector<1x32x4xbf16> to vector<32x4xbf16>
    %cst_29 = arith.constant dense<0.000000e+00> : vector<16x4xf32>
    %45 = tpu.matmul %18, %44, %cst_29 {dimension_numbers = #tpu.dot_dimension_numbers<[1], [0], [0], [1], [0, 0, 1, 1], [], []>} : vector<16x32xbf16>, vector<32x4xbf16>, vector<16x4xf32> -> vector<16x4xf32>
    %c0_30 = arith.constant 0 : index
    %c0_31 = arith.constant 0 : index
    %46 = vector.load %arg8[%c0_30, %c0_31] : memref<8x4xf32, #tpu.memory_space<vmem>>, vector<1x4xf32>
    %47 = vector.shape_cast %46 : vector<1x4xf32> to vector<4xf32>
    %48 = vector.shape_cast %47 : vector<4xf32> to vector<1x4xf32>
    %49 = vector.broadcast %48 : vector<1x4xf32> to vector<16x4xf32>
    %50 = arith.addf %45, %49 : vector<16x4xf32>
    %51 = arith.truncf %50 : vector<16x4xf32> to vector<16x4xbf16>
    %c0_32 = arith.constant 0 : index
    %c0_33 = arith.constant 0 : index
    %c0_34 = arith.constant 0 : index
    %c0_35 = arith.constant 0 : index
    %52 = vector.load %arg11[%c0_32, %c0_33, %c0_34, %c0_35] : memref<1x8x16x4xbf16, #tpu.memory_space<vmem>>, vector<1x1x16x4xbf16>
    %53 = vector.shape_cast %52 : vector<1x1x16x4xbf16> to vector<16x4xbf16>
    %54 = vector.shape_cast %51 : vector<16x4xbf16> to vector<1x1x16x4xbf16>
    tpu.vector_store %arg11[%c0_32, %c0_33, %c0_34, %c0_35], %54 {strides = array<i32>} : memref<1x8x16x4xbf16, #tpu.memory_space<vmem>>, vector<1x1x16x4xbf16>,
    %c1 = arith.constant 1 : index
    %c0_36 = arith.constant 0 : index
    %c0_37 = arith.constant 0 : index
    %55 = vector.load %arg3[%c1, %c0_36, %c0_37] : memref<8x32x4xbf16, #tpu.memory_space<vmem>>, vector<1x32x4xbf16>
    %56 = vector.shape_cast %55 : vector<1x32x4xbf16> to vector<32x4xbf16>
    %cst_38 = arith.constant dense<0.000000e+00> : vector<16x4xf32>
    %57 = tpu.matmul %18, %56, %cst_38 {dimension_numbers = #tpu.dot_dimension_numbers<[1], [0], [0], [1], [0, 0, 1, 1], [], []>} : vector<16x32xbf16>, vector<32x4xbf16>, vector<16x4xf32> -> vector<16x4xf32>
    %c1_39 = arith.constant 1 : index
    %c0_40 = arith.constant 0 : index
    %58 = vector.load %arg6[%c1_39, %c0_40] : memref<8x4xf32, #tpu.memory_space<vmem>>, vector<1x4xf32>
    %59 = vector.shape_cast %58 : vector<1x4xf32> to vector<4xf32>
    %60 = vector.shape_cast %59 : vector<4xf32> to vector<1x4xf32>
    %61 = vector.broadcast %60 : vector<1x4xf32> to vector<16x4xf32>
    %62 = arith.addf %57, %61 : vector<16x4xf32>
    %63 = arith.truncf %62 : vector<16x4xf32> to vector<16x4xbf16>
    %c0_41 = arith.constant 0 : index
    %c1_42 = arith.constant 1 : index
    %c0_43 = arith.constant 0 : index
    %c0_44 = arith.constant 0 : index
    %64 = vector.load %arg9[%c0_41, %c1_42, %c0_43, %c0_44] : memref<1x8x16x4xbf16, #tpu.memory_space<vmem>>, vector<1x1x16x4xbf16>
    %65 = vector.shape_cast %64 : vector<1x1x16x4xbf16> to vector<16x4xbf16>
    %66 = vector.shape_cast %63 : vector<16x4xbf16> to vector<1x1x16x4xbf16>
    tpu.vector_store %arg9[%c0_41, %c1_42, %c0_43, %c0_44], %66 {strides = array<i32>} : memref<1x8x16x4xbf16, #tpu.memory_space<vmem>>, vector<1x1x16x4xbf16>,
    %c1_45 = arith.constant 1 : index
    %c0_46 = arith.constant 0 : index
    %c0_47 = arith.constant 0 : index
    %67 = vector.load %arg4[%c1_45, %c0_46, %c0_47] : memref<8x32x4xbf16, #tpu.memory_space<vmem>>, vector<1x32x4xbf16>
    %68 = vector.shape_cast %67 : vector<1x32x4xbf16> to vector<32x4xbf16>
    %cst_48 = arith.constant dense<0.000000e+00> : vector<16x4xf32>
    %69 = tpu.matmul %18, %68, %cst_48 {dimension_numbers = #tpu.dot_dimension_numbers<[1], [0], [0], [1], [0, 0, 1, 1], [], []>} : vector<16x32xbf16>, vector<32x4xbf16>, vector<16x4xf32> -> vector<16x4xf32>
    %c1_49 = arith.constant 1 : index
    %c0_50 = arith.constant 0 : index
    %70 = vector.load %arg7[%c1_49, %c0_50] : memref<8x4xf32, #tpu.memory_space<vmem>>, vector<1x4xf32>
    %71 = vector.shape_cast %70 : vector<1x4xf32> to vector<4xf32>
    %72 = vector.shape_cast %71 : vector<4xf32> to vector<1x4xf32>
    %73 = vector.broadcast %72 : vector<1x4xf32> to vector<16x4xf32>
    %74 = arith.addf %69, %73 : vector<16x4xf32>
    %75 = arith.truncf %74 : vector<16x4xf32> to vector<16x4xbf16>
    %c0_51 = arith.constant 0 : index
    %c1_52 = arith.constant 1 : index
    %c0_53 = arith.constant 0 : index
    %c0_54 = arith.constant 0 : index
    %76 = vector.load %arg10[%c0_51, %c1_52, %c0_53, %c0_54] : memref<1x8x16x4xbf16, #tpu.memory_space<vmem>>, vector<1x1x16x4xbf16>
    %77 = vector.shape_cast %76 : vector<1x1x16x4xbf16> to vector<16x4xbf16>
    %78 = vector.shape_cast %75 : vector<16x4xbf16> to vector<1x1x16x4xbf16>
    tpu.vector_store %arg10[%c0_51, %c1_52, %c0_53, %c0_54], %78 {strides = array<i32>} : memref<1x8x16x4xbf16, #tpu.memory_space<vmem>>, vector<1x1x16x4xbf16>,
    %c1_55 = arith.constant 1 : index
    %c0_56 = arith.constant 0 : index
    %c0_57 = arith.constant 0 : index
    %79 = vector.load %arg5[%c1_55, %c0_56, %c0_57] : memref<8x32x4xbf16, #tpu.memory_space<vmem>>, vector<1x32x4xbf16>
    %80 = vector.shape_cast %79 : vector<1x32x4xbf16> to vector<32x4xbf16>
    %cst_58 = arith.constant dense<0.000000e+00> : vector<16x4xf32>
    %81 = tpu.matmul %18, %80, %cst_58 {dimension_numbers = #tpu.dot_dimension_numbers<[1], [0], [0], [1], [0, 0, 1, 1], [], []>} : vector<16x32xbf16>, vector<32x4xbf16>, vector<16x4xf32> -> vector<16x4xf32>
    %c1_59 = arith.constant 1 : index
    %c0_60 = arith.constant 0 : index
    %82 = vector.load %arg8[%c1_59, %c0_60] : memref<8x4xf32, #tpu.memory_space<vmem>>, vector<1x4xf32>
    %83 = vector.shape_cast %82 : vector<1x4xf32> to vector<4xf32>
    %84 = vector.shape_cast %83 : vector<4xf32> to vector<1x4xf32>
    %85 = vector.broadcast %84 : vector<1x4xf32> to vector<16x4xf32>
    %86 = arith.addf %81, %85 : vector<16x4xf32>
    %87 = arith.truncf %86 : vector<16x4xf32> to vector<16x4xbf16>
    %c0_61 = arith.constant 0 : index
    %c1_62 = arith.constant 1 : index
    %c0_63 = arith.constant 0 : index
    %c0_64 = arith.constant 0 : index
    %88 = vector.load %arg11[%c0_61, %c1_62, %c0_63, %c0_64] : memref<1x8x16x4xbf16, #tpu.memory_space<vmem>>, vector<1x1x16x4xbf16>
    %89 = vector.shape_cast %88 : vector<1x1x16x4xbf16> to vector<16x4xbf16>
    %90 = vector.shape_cast %87 : vector<16x4xbf16> to vector<1x1x16x4xbf16>
    tpu.vector_store %arg11[%c0_61, %c1_62, %c0_63, %c0_64], %90 {strides = array<i32>} : memref<1x8x16x4xbf16, #tpu.memory_space<vmem>>, vector<1x1x16x4xbf16>,
    %c2 = arith.constant 2 : index
    %c0_65 = arith.constant 0 : index
    %c0_66 = arith.constant 0 : index
    %91 = vector.load %arg3[%c2, %c0_65, %c0_66] : memref<8x32x4xbf16, #tpu.memory_space<vmem>>, vector<1x32x4xbf16>
    %92 = vector.shape_cast %91 : vector<1x32x4xbf16> to vector<32x4xbf16>
    %cst_67 = arith.constant dense<0.000000e+00> : vector<16x4xf32>
    %93 = tpu.matmul %18, %92, %cst_67 {dimension_numbers = #tpu.dot_dimension_numbers<[1], [0], [0], [1], [0, 0, 1, 1], [], []>} : vector<16x32xbf16>, vector<32x4xbf16>, vector<16x4xf32> -> vector<16x4xf32>
    %c2_68 = arith.constant 2 : index
    %c0_69 = arith.constant 0 : index
    %94 = vector.load %arg6[%c2_68, %c0_69] : memref<8x4xf32, #tpu.memory_space<vmem>>, vector<1x4xf32>
    %95 = vector.shape_cast %94 : vector<1x4xf32> to vector<4xf32>
    %96 = vector.shape_cast %95 : vector<4xf32> to vector<1x4xf32>
    %97 = vector.broadcast %96 : vector<1x4xf32> to vector<16x4xf32>
    %98 = arith.addf %93, %97 : vector<16x4xf32>
    %99 = arith.truncf %98 : vector<16x4xf32> to vector<16x4xbf16>
    %c0_70 = arith.constant 0 : index
    %c2_71 = arith.constant 2 : index
    %c0_72 = arith.constant 0 : index
    %c0_73 = arith.constant 0 : index
    %100 = vector.load %arg9[%c0_70, %c2_71, %c0_72, %c0_73] : memref<1x8x16x4xbf16, #tpu.memory_space<vmem>>, vector<1x1x16x4xbf16>
    %101 = vector.shape_cast %100 : vector<1x1x16x4xbf16> to vector<16x4xbf16>
    %102 = vector.shape_cast %99 : vector<16x4xbf16> to vector<1x1x16x4xbf16>
    tpu.vector_store %arg9[%c0_70, %c2_71, %c0_72, %c0_73], %102 {strides = array<i32>} : memref<1x8x16x4xbf16, #tpu.memory_space<vmem>>, vector<1x1x16x4xbf16>,
    %c2_74 = arith.constant 2 : index
    %c0_75 = arith.constant 0 : index
    %c0_76 = arith.constant 0 : index
    %103 = vector.load %arg4[%c2_74, %c0_75, %c0_76] : memref<8x32x4xbf16, #tpu.memory_space<vmem>>, vector<1x32x4xbf16>
    %104 = vector.shape_cast %103 : vector<1x32x4xbf16> to vector<32x4xbf16>
    %cst_77 = arith.constant dense<0.000000e+00> : vector<16x4xf32>
    %105 = tpu.matmul %18, %104, %cst_77 {dimension_numbers = #tpu.dot_dimension_numbers<[1], [0], [0], [1], [0, 0, 1, 1], [], []>} : vector<16x32xbf16>, vector<32x4xbf16>, vector<16x4xf32> -> vector<16x4xf32>
    %c2_78 = arith.constant 2 : index
    %c0_79 = arith.constant 0 : index
    %106 = vector.load %arg7[%c2_78, %c0_79] : memref<8x4xf32, #tpu.memory_space<vmem>>, vector<1x4xf32>
    %107 = vector.shape_cast %106 : vector<1x4xf32> to vector<4xf32>
    %108 = vector.shape_cast %107 : vector<4xf32> to vector<1x4xf32>
    %109 = vector.broadcast %108 : vector<1x4xf32> to vector<16x4xf32>
    %110 = arith.addf %105, %109 : vector<16x4xf32>
    %111 = arith.truncf %110 : vector<16x4xf32> to vector<16x4xbf16>
    %c0_80 = arith.constant 0 : index
    %c2_81 = arith.constant 2 : index
    %c0_82 = arith.constant 0 : index
    %c0_83 = arith.constant 0 : index
    %112 = vector.load %arg10[%c0_80, %c2_81, %c0_82, %c0_83] : memref<1x8x16x4xbf16, #tpu.memory_space<vmem>>, vector<1x1x16x4xbf16>
    %113 = vector.shape_cast %112 : vector<1x1x16x4xbf16> to vector<16x4xbf16>
    %114 = vector.shape_cast %111 : vector<16x4xbf16> to vector<1x1x16x4xbf16>
    tpu.vector_store %arg10[%c0_80, %c2_81, %c0_82, %c0_83], %114 {strides = array<i32>} : memref<1x8x16x4xbf16, #tpu.memory_space<vmem>>, vector<1x1x16x4xbf16>,
    %c2_84 = arith.constant 2 : index
    %c0_85 = arith.constant 0 : index
    %c0_86 = arith.constant 0 : index
    %115 = vector.load %arg5[%c2_84, %c0_85, %c0_86] : memref<8x32x4xbf16, #tpu.memory_space<vmem>>, vector<1x32x4xbf16>
    %116 = vector.shape_cast %115 : vector<1x32x4xbf16> to vector<32x4xbf16>
    %cst_87 = arith.constant dense<0.000000e+00> : vector<16x4xf32>
    %117 = tpu.matmul %18, %116, %cst_87 {dimension_numbers = #tpu.dot_dimension_numbers<[1], [0], [0], [1], [0, 0, 1, 1], [], []>} : vector<16x32xbf16>, vector<32x4xbf16>, vector<16x4xf32> -> vector<16x4xf32>
    %c2_88 = arith.constant 2 : index
    %c0_89 = arith.constant 0 : index
    %118 = vector.load %arg8[%c2_88, %c0_89] : memref<8x4xf32, #tpu.memory_space<vmem>>, vector<1x4xf32>
    %119 = vector.shape_cast %118 : vector<1x4xf32> to vector<4xf32>
    %120 = vector.shape_cast %119 : vector<4xf32> to vector<1x4xf32>
    %121 = vector.broadcast %120 : vector<1x4xf32> to vector<16x4xf32>
    %122 = arith.addf %117, %121 : vector<16x4xf32>
    %123 = arith.truncf %122 : vector<16x4xf32> to vector<16x4xbf16>
    %c0_90 = arith.constant 0 : index
    %c2_91 = arith.constant 2 : index
    %c0_92 = arith.constant 0 : index
    %c0_93 = arith.constant 0 : index
    %124 = vector.load %arg11[%c0_90, %c2_91, %c0_92, %c0_93] : memref<1x8x16x4xbf16, #tpu.memory_space<vmem>>, vector<1x1x16x4xbf16>
    %125 = vector.shape_cast %124 : vector<1x1x16x4xbf16> to vector<16x4xbf16>
    %126 = vector.shape_cast %123 : vector<16x4xbf16> to vector<1x1x16x4xbf16>
    tpu.vector_store %arg11[%c0_90, %c2_91, %c0_92, %c0_93], %126 {strides = array<i32>} : memref<1x8x16x4xbf16, #tpu.memory_space<vmem>>, vector<1x1x16x4xbf16>,
    %c3 = arith.constant 3 : index
    %c0_94 = arith.constant 0 : index
    %c0_95 = arith.constant 0 : index
    %127 = vector.load %arg3[%c3, %c0_94, %c0_95] : memref<8x32x4xbf16, #tpu.memory_space<vmem>>, vector<1x32x4xbf16>
    %128 = vector.shape_cast %127 : vector<1x32x4xbf16> to vector<32x4xbf16>
    %cst_96 = arith.constant dense<0.000000e+00> : vector<16x4xf32>
    %129 = tpu.matmul %18, %128, %cst_96 {dimension_numbers = #tpu.dot_dimension_numbers<[1], [0], [0], [1], [0, 0, 1, 1], [], []>} : vector<16x32xbf16>, vector<32x4xbf16>, vector<16x4xf32> -> vector<16x4xf32>
    %c3_97 = arith.constant 3 : index
    %c0_98 = arith.constant 0 : index
    %130 = vector.load %arg6[%c3_97, %c0_98] : memref<8x4xf32, #tpu.memory_space<vmem>>, vector<1x4xf32>
    %131 = vector.shape_cast %130 : vector<1x4xf32> to vector<4xf32>
    %132 = vector.shape_cast %131 : vector<4xf32> to vector<1x4xf32>
    %133 = vector.broadcast %132 : vector<1x4xf32> to vector<16x4xf32>
    %134 = arith.addf %129, %133 : vector<16x4xf32>
    %135 = arith.truncf %134 : vector<16x4xf32> to vector<16x4xbf16>
    %c0_99 = arith.constant 0 : index
    %c3_100 = arith.constant 3 : index
    %c0_101 = arith.constant 0 : index
    %c0_102 = arith.constant 0 : index
    %136 = vector.load %arg9[%c0_99, %c3_100, %c0_101, %c0_102] : memref<1x8x16x4xbf16, #tpu.memory_space<vmem>>, vector<1x1x16x4xbf16>
    %137 = vector.shape_cast %136 : vector<1x1x16x4xbf16> to vector<16x4xbf16>
    %138 = vector.shape_cast %135 : vector<16x4xbf16> to vector<1x1x16x4xbf16>
    tpu.vector_store %arg9[%c0_99, %c3_100, %c0_101, %c0_102], %138 {strides = array<i32>} : memref<1x8x16x4xbf16, #tpu.memory_space<vmem>>, vector<1x1x16x4xbf16>,
    %c3_103 = arith.constant 3 : index
    %c0_104 = arith.constant 0 : index
    %c0_105 = arith.constant 0 : index
    %139 = vector.load %arg4[%c3_103, %c0_104, %c0_105] : memref<8x32x4xbf16, #tpu.memory_space<vmem>>, vector<1x32x4xbf16>
    %140 = vector.shape_cast %139 : vector<1x32x4xbf16> to vector<32x4xbf16>
    %cst_106 = arith.constant dense<0.000000e+00> : vector<16x4xf32>
    %141 = tpu.matmul %18, %140, %cst_106 {dimension_numbers = #tpu.dot_dimension_numbers<[1], [0], [0], [1], [0, 0, 1, 1], [], []>} : vector<16x32xbf16>, vector<32x4xbf16>, vector<16x4xf32> -> vector<16x4xf32>
    %c3_107 = arith.constant 3 : index
    %c0_108 = arith.constant 0 : index
    %142 = vector.load %arg7[%c3_107, %c0_108] : memref<8x4xf32, #tpu.memory_space<vmem>>, vector<1x4xf32>
    %143 = vector.shape_cast %142 : vector<1x4xf32> to vector<4xf32>
    %144 = vector.shape_cast %143 : vector<4xf32> to vector<1x4xf32>
    %145 = vector.broadcast %144 : vector<1x4xf32> to vector<16x4xf32>
    %146 = arith.addf %141, %145 : vector<16x4xf32>
    %147 = arith.truncf %146 : vector<16x4xf32> to vector<16x4xbf16>
    %c0_109 = arith.constant 0 : index
    %c3_110 = arith.constant 3 : index
    %c0_111 = arith.constant 0 : index
    %c0_112 = arith.constant 0 : index
    %148 = vector.load %arg10[%c0_109, %c3_110, %c0_111, %c0_112] : memref<1x8x16x4xbf16, #tpu.memory_space<vmem>>, vector<1x1x16x4xbf16>
    %149 = vector.shape_cast %148 : vector<1x1x16x4xbf16> to vector<16x4xbf16>
    %150 = vector.shape_cast %147 : vector<16x4xbf16> to vector<1x1x16x4xbf16>
    tpu.vector_store %arg10[%c0_109, %c3_110, %c0_111, %c0_112], %150 {strides = array<i32>} : memref<1x8x16x4xbf16, #tpu.memory_space<vmem>>, vector<1x1x16x4xbf16>,
    %c3_113 = arith.constant 3 : index
    %c0_114 = arith.constant 0 : index
    %c0_115 = arith.constant 0 : index
    %151 = vector.load %arg5[%c3_113, %c0_114, %c0_115] : memref<8x32x4xbf16, #tpu.memory_space<vmem>>, vector<1x32x4xbf16>
    %152 = vector.shape_cast %151 : vector<1x32x4xbf16> to vector<32x4xbf16>
    %cst_116 = arith.constant dense<0.000000e+00> : vector<16x4xf32>
    %153 = tpu.matmul %18, %152, %cst_116 {dimension_numbers = #tpu.dot_dimension_numbers<[1], [0], [0], [1], [0, 0, 1, 1], [], []>} : vector<16x32xbf16>, vector<32x4xbf16>, vector<16x4xf32> -> vector<16x4xf32>
    %c3_117 = arith.constant 3 : index
    %c0_118 = arith.constant 0 : index
    %154 = vector.load %arg8[%c3_117, %c0_118] : memref<8x4xf32, #tpu.memory_space<vmem>>, vector<1x4xf32>
    %155 = vector.shape_cast %154 : vector<1x4xf32> to vector<4xf32>
    %156 = vector.shape_cast %155 : vector<4xf32> to vector<1x4xf32>
    %157 = vector.broadcast %156 : vector<1x4xf32> to vector<16x4xf32>
    %158 = arith.addf %153, %157 : vector<16x4xf32>
    %159 = arith.truncf %158 : vector<16x4xf32> to vector<16x4xbf16>
    %c0_119 = arith.constant 0 : index
    %c3_120 = arith.constant 3 : index
    %c0_121 = arith.constant 0 : index
    %c0_122 = arith.constant 0 : index
    %160 = vector.load %arg11[%c0_119, %c3_120, %c0_121, %c0_122] : memref<1x8x16x4xbf16, #tpu.memory_space<vmem>>, vector<1x1x16x4xbf16>
    %161 = vector.shape_cast %160 : vector<1x1x16x4xbf16> to vector<16x4xbf16>
    %162 = vector.shape_cast %159 : vector<16x4xbf16> to vector<1x1x16x4xbf16>
    tpu.vector_store %arg11[%c0_119, %c3_120, %c0_121, %c0_122], %162 {strides = array<i32>} : memref<1x8x16x4xbf16, #tpu.memory_space<vmem>>, vector<1x1x16x4xbf16>,
    %c4 = arith.constant 4 : index
    %c0_123 = arith.constant 0 : index
    %c0_124 = arith.constant 0 : index
    %163 = vector.load %arg3[%c4, %c0_123, %c0_124] : memref<8x32x4xbf16, #tpu.memory_space<vmem>>, vector<1x32x4xbf16>
    %164 = vector.shape_cast %163 : vector<1x32x4xbf16> to vector<32x4xbf16>
    %cst_125 = arith.constant dense<0.000000e+00> : vector<16x4xf32>
    %165 = tpu.matmul %18, %164, %cst_125 {dimension_numbers = #tpu.dot_dimension_numbers<[1], [0], [0], [1], [0, 0, 1, 1], [], []>} : vector<16x32xbf16>, vector<32x4xbf16>, vector<16x4xf32> -> vector<16x4xf32>
    %c4_126 = arith.constant 4 : index
    %c0_127 = arith.constant 0 : index
    %166 = vector.load %arg6[%c4_126, %c0_127] : memref<8x4xf32, #tpu.memory_space<vmem>>, vector<1x4xf32>
    %167 = vector.shape_cast %166 : vector<1x4xf32> to vector<4xf32>
    %168 = vector.shape_cast %167 : vector<4xf32> to vector<1x4xf32>
    %169 = vector.broadcast %168 : vector<1x4xf32> to vector<16x4xf32>
    %170 = arith.addf %165, %169 : vector<16x4xf32>
    %171 = arith.truncf %170 : vector<16x4xf32> to vector<16x4xbf16>
    %c0_128 = arith.constant 0 : index
    %c4_129 = arith.constant 4 : index
    %c0_130 = arith.constant 0 : index
    %c0_131 = arith.constant 0 : index
    %172 = vector.load %arg9[%c0_128, %c4_129, %c0_130, %c0_131] : memref<1x8x16x4xbf16, #tpu.memory_space<vmem>>, vector<1x1x16x4xbf16>
    %173 = vector.shape_cast %172 : vector<1x1x16x4xbf16> to vector<16x4xbf16>
    %174 = vector.shape_cast %171 : vector<16x4xbf16> to vector<1x1x16x4xbf16>
    tpu.vector_store %arg9[%c0_128, %c4_129, %c0_130, %c0_131], %174 {strides = array<i32>} : memref<1x8x16x4xbf16, #tpu.memory_space<vmem>>, vector<1x1x16x4xbf16>,
    %c4_132 = arith.constant 4 : index
    %c0_133 = arith.constant 0 : index
    %c0_134 = arith.constant 0 : index
    %175 = vector.load %arg4[%c4_132, %c0_133, %c0_134] : memref<8x32x4xbf16, #tpu.memory_space<vmem>>, vector<1x32x4xbf16>
    %176 = vector.shape_cast %175 : vector<1x32x4xbf16> to vector<32x4xbf16>
    %cst_135 = arith.constant dense<0.000000e+00> : vector<16x4xf32>
    %177 = tpu.matmul %18, %176, %cst_135 {dimension_numbers = #tpu.dot_dimension_numbers<[1], [0], [0], [1], [0, 0, 1, 1], [], []>} : vector<16x32xbf16>, vector<32x4xbf16>, vector<16x4xf32> -> vector<16x4xf32>
    %c4_136 = arith.constant 4 : index
    %c0_137 = arith.constant 0 : index
    %178 = vector.load %arg7[%c4_136, %c0_137] : memref<8x4xf32, #tpu.memory_space<vmem>>, vector<1x4xf32>
    %179 = vector.shape_cast %178 : vector<1x4xf32> to vector<4xf32>
    %180 = vector.shape_cast %179 : vector<4xf32> to vector<1x4xf32>
    %181 = vector.broadcast %180 : vector<1x4xf32> to vector<16x4xf32>
    %182 = arith.addf %177, %181 : vector<16x4xf32>
    %183 = arith.truncf %182 : vector<16x4xf32> to vector<16x4xbf16>
    %c0_138 = arith.constant 0 : index
    %c4_139 = arith.constant 4 : index
    %c0_140 = arith.constant 0 : index
    %c0_141 = arith.constant 0 : index
    %184 = vector.load %arg10[%c0_138, %c4_139, %c0_140, %c0_141] : memref<1x8x16x4xbf16, #tpu.memory_space<vmem>>, vector<1x1x16x4xbf16>
    %185 = vector.shape_cast %184 : vector<1x1x16x4xbf16> to vector<16x4xbf16>
    %186 = vector.shape_cast %183 : vector<16x4xbf16> to vector<1x1x16x4xbf16>
    tpu.vector_store %arg10[%c0_138, %c4_139, %c0_140, %c0_141], %186 {strides = array<i32>} : memref<1x8x16x4xbf16, #tpu.memory_space<vmem>>, vector<1x1x16x4xbf16>,
    %c4_142 = arith.constant 4 : index
    %c0_143 = arith.constant 0 : index
    %c0_144 = arith.constant 0 : index
    %187 = vector.load %arg5[%c4_142, %c0_143, %c0_144] : memref<8x32x4xbf16, #tpu.memory_space<vmem>>, vector<1x32x4xbf16>
    %188 = vector.shape_cast %187 : vector<1x32x4xbf16> to vector<32x4xbf16>
    %cst_145 = arith.constant dense<0.000000e+00> : vector<16x4xf32>
    %189 = tpu.matmul %18, %188, %cst_145 {dimension_numbers = #tpu.dot_dimension_numbers<[1], [0], [0], [1], [0, 0, 1, 1], [], []>} : vector<16x32xbf16>, vector<32x4xbf16>, vector<16x4xf32> -> vector<16x4xf32>
    %c4_146 = arith.constant 4 : index
    %c0_147 = arith.constant 0 : index
    %190 = vector.load %arg8[%c4_146, %c0_147] : memref<8x4xf32, #tpu.memory_space<vmem>>, vector<1x4xf32>
    %191 = vector.shape_cast %190 : vector<1x4xf32> to vector<4xf32>
    %192 = vector.shape_cast %191 : vector<4xf32> to vector<1x4xf32>
    %193 = vector.broadcast %192 : vector<1x4xf32> to vector<16x4xf32>
    %194 = arith.addf %189, %193 : vector<16x4xf32>
    %195 = arith.truncf %194 : vector<16x4xf32> to vector<16x4xbf16>
    %c0_148 = arith.constant 0 : index
    %c4_149 = arith.constant 4 : index
    %c0_150 = arith.constant 0 : index
    %c0_151 = arith.constant 0 : index
    %196 = vector.load %arg11[%c0_148, %c4_149, %c0_150, %c0_151] : memref<1x8x16x4xbf16, #tpu.memory_space<vmem>>, vector<1x1x16x4xbf16>
    %197 = vector.shape_cast %196 : vector<1x1x16x4xbf16> to vector<16x4xbf16>
    %198 = vector.shape_cast %195 : vector<16x4xbf16> to vector<1x1x16x4xbf16>
    tpu.vector_store %arg11[%c0_148, %c4_149, %c0_150, %c0_151], %198 {strides = array<i32>} : memref<1x8x16x4xbf16, #tpu.memory_space<vmem>>, vector<1x1x16x4xbf16>,
    %c5 = arith.constant 5 : index
    %c0_152 = arith.constant 0 : index
    %c0_153 = arith.constant 0 : index
    %199 = vector.load %arg3[%c5, %c0_152, %c0_153] : memref<8x32x4xbf16, #tpu.memory_space<vmem>>, vector<1x32x4xbf16>
    %200 = vector.shape_cast %199 : vector<1x32x4xbf16> to vector<32x4xbf16>
    %cst_154 = arith.constant dense<0.000000e+00> : vector<16x4xf32>
    %201 = tpu.matmul %18, %200, %cst_154 {dimension_numbers = #tpu.dot_dimension_numbers<[1], [0], [0], [1], [0, 0, 1, 1], [], []>} : vector<16x32xbf16>, vector<32x4xbf16>, vector<16x4xf32> -> vector<16x4xf32>
    %c5_155 = arith.constant 5 : index
    %c0_156 = arith.constant 0 : index
    %202 = vector.load %arg6[%c5_155, %c0_156] : memref<8x4xf32, #tpu.memory_space<vmem>>, vector<1x4xf32>
    %203 = vector.shape_cast %202 : vector<1x4xf32> to vector<4xf32>
    %204 = vector.shape_cast %203 : vector<4xf32> to vector<1x4xf32>
    %205 = vector.broadcast %204 : vector<1x4xf32> to vector<16x4xf32>
    %206 = arith.addf %201, %205 : vector<16x4xf32>
    %207 = arith.truncf %206 : vector<16x4xf32> to vector<16x4xbf16>
    %c0_157 = arith.constant 0 : index
    %c5_158 = arith.constant 5 : index
    %c0_159 = arith.constant 0 : index
    %c0_160 = arith.constant 0 : index
    %208 = vector.load %arg9[%c0_157, %c5_158, %c0_159, %c0_160] : memref<1x8x16x4xbf16, #tpu.memory_space<vmem>>, vector<1x1x16x4xbf16>
    %209 = vector.shape_cast %208 : vector<1x1x16x4xbf16> to vector<16x4xbf16>
    %210 = vector.shape_cast %207 : vector<16x4xbf16> to vector<1x1x16x4xbf16>
    tpu.vector_store %arg9[%c0_157, %c5_158, %c0_159, %c0_160], %210 {strides = array<i32>} : memref<1x8x16x4xbf16, #tpu.memory_space<vmem>>, vector<1x1x16x4xbf16>,
    %c5_161 = arith.constant 5 : index
    %c0_162 = arith.constant 0 : index
    %c0_163 = arith.constant 0 : index
    %211 = vector.load %arg4[%c5_161, %c0_162, %c0_163] : memref<8x32x4xbf16, #tpu.memory_space<vmem>>, vector<1x32x4xbf16>
    %212 = vector.shape_cast %211 : vector<1x32x4xbf16> to vector<32x4xbf16>
    %cst_164 = arith.constant dense<0.000000e+00> : vector<16x4xf32>
    %213 = tpu.matmul %18, %212, %cst_164 {dimension_numbers = #tpu.dot_dimension_numbers<[1], [0], [0], [1], [0, 0, 1, 1], [], []>} : vector<16x32xbf16>, vector<32x4xbf16>, vector<16x4xf32> -> vector<16x4xf32>
    %c5_165 = arith.constant 5 : index
    %c0_166 = arith.constant 0 : index
    %214 = vector.load %arg7[%c5_165, %c0_166] : memref<8x4xf32, #tpu.memory_space<vmem>>, vector<1x4xf32>
    %215 = vector.shape_cast %214 : vector<1x4xf32> to vector<4xf32>
    %216 = vector.shape_cast %215 : vector<4xf32> to vector<1x4xf32>
    %217 = vector.broadcast %216 : vector<1x4xf32> to vector<16x4xf32>
    %218 = arith.addf %213, %217 : vector<16x4xf32>
    %219 = arith.truncf %218 : vector<16x4xf32> to vector<16x4xbf16>
    %c0_167 = arith.constant 0 : index
    %c5_168 = arith.constant 5 : index
    %c0_169 = arith.constant 0 : index
    %c0_170 = arith.constant 0 : index
    %220 = vector.load %arg10[%c0_167, %c5_168, %c0_169, %c0_170] : memref<1x8x16x4xbf16, #tpu.memory_space<vmem>>, vector<1x1x16x4xbf16>
    %221 = vector.shape_cast %220 : vector<1x1x16x4xbf16> to vector<16x4xbf16>
    %222 = vector.shape_cast %219 : vector<16x4xbf16> to vector<1x1x16x4xbf16>
    tpu.vector_store %arg10[%c0_167, %c5_168, %c0_169, %c0_170], %222 {strides = array<i32>} : memref<1x8x16x4xbf16, #tpu.memory_space<vmem>>, vector<1x1x16x4xbf16>,
    %c5_171 = arith.constant 5 : index
    %c0_172 = arith.constant 0 : index
    %c0_173 = arith.constant 0 : index
    %223 = vector.load %arg5[%c5_171, %c0_172, %c0_173] : memref<8x32x4xbf16, #tpu.memory_space<vmem>>, vector<1x32x4xbf16>
    %224 = vector.shape_cast %223 : vector<1x32x4xbf16> to vector<32x4xbf16>
    %cst_174 = arith.constant dense<0.000000e+00> : vector<16x4xf32>
    %225 = tpu.matmul %18, %224, %cst_174 {dimension_numbers = #tpu.dot_dimension_numbers<[1], [0], [0], [1], [0, 0, 1, 1], [], []>} : vector<16x32xbf16>, vector<32x4xbf16>, vector<16x4xf32> -> vector<16x4xf32>
    %c5_175 = arith.constant 5 : index
    %c0_176 = arith.constant 0 : index
    %226 = vector.load %arg8[%c5_175, %c0_176] : memref<8x4xf32, #tpu.memory_space<vmem>>, vector<1x4xf32>
    %227 = vector.shape_cast %226 : vector<1x4xf32> to vector<4xf32>
    %228 = vector.shape_cast %227 : vector<4xf32> to vector<1x4xf32>
    %229 = vector.broadcast %228 : vector<1x4xf32> to vector<16x4xf32>
    %230 = arith.addf %225, %229 : vector<16x4xf32>
    %231 = arith.truncf %230 : vector<16x4xf32> to vector<16x4xbf16>
    %c0_177 = arith.constant 0 : index
    %c5_178 = arith.constant 5 : index
    %c0_179 = arith.constant 0 : index
    %c0_180 = arith.constant 0 : index
    %232 = vector.load %arg11[%c0_177, %c5_178, %c0_179, %c0_180] : memref<1x8x16x4xbf16, #tpu.memory_space<vmem>>, vector<1x1x16x4xbf16>
    %233 = vector.shape_cast %232 : vector<1x1x16x4xbf16> to vector<16x4xbf16>
    %234 = vector.shape_cast %231 : vector<16x4xbf16> to vector<1x1x16x4xbf16>
    tpu.vector_store %arg11[%c0_177, %c5_178, %c0_179, %c0_180], %234 {strides = array<i32>} : memref<1x8x16x4xbf16, #tpu.memory_space<vmem>>, vector<1x1x16x4xbf16>,
    %c6 = arith.constant 6 : index
    %c0_181 = arith.constant 0 : index
    %c0_182 = arith.constant 0 : index
    %235 = vector.load %arg3[%c6, %c0_181, %c0_182] : memref<8x32x4xbf16, #tpu.memory_space<vmem>>, vector<1x32x4xbf16>
    %236 = vector.shape_cast %235 : vector<1x32x4xbf16> to vector<32x4xbf16>
    %cst_183 = arith.constant dense<0.000000e+00> : vector<16x4xf32>
    %237 = tpu.matmul %18, %236, %cst_183 {dimension_numbers = #tpu.dot_dimension_numbers<[1], [0], [0], [1], [0, 0, 1, 1], [], []>} : vector<16x32xbf16>, vector<32x4xbf16>, vector<16x4xf32> -> vector<16x4xf32>
    %c6_184 = arith.constant 6 : index
    %c0_185 = arith.constant 0 : index
    %238 = vector.load %arg6[%c6_184, %c0_185] : memref<8x4xf32, #tpu.memory_space<vmem>>, vector<1x4xf32>
    %239 = vector.shape_cast %238 : vector<1x4xf32> to vector<4xf32>
    %240 = vector.shape_cast %239 : vector<4xf32> to vector<1x4xf32>
    %241 = vector.broadcast %240 : vector<1x4xf32> to vector<16x4xf32>
    %242 = arith.addf %237, %241 : vector<16x4xf32>
    %243 = arith.truncf %242 : vector<16x4xf32> to vector<16x4xbf16>
    %c0_186 = arith.constant 0 : index
    %c6_187 = arith.constant 6 : index
    %c0_188 = arith.constant 0 : index
    %c0_189 = arith.constant 0 : index
    %244 = vector.load %arg9[%c0_186, %c6_187, %c0_188, %c0_189] : memref<1x8x16x4xbf16, #tpu.memory_space<vmem>>, vector<1x1x16x4xbf16>
    %245 = vector.shape_cast %244 : vector<1x1x16x4xbf16> to vector<16x4xbf16>
    %246 = vector.shape_cast %243 : vector<16x4xbf16> to vector<1x1x16x4xbf16>
    tpu.vector_store %arg9[%c0_186, %c6_187, %c0_188, %c0_189], %246 {strides = array<i32>} : memref<1x8x16x4xbf16, #tpu.memory_space<vmem>>, vector<1x1x16x4xbf16>,
    %c6_190 = arith.constant 6 : index
    %c0_191 = arith.constant 0 : index
    %c0_192 = arith.constant 0 : index
    %247 = vector.load %arg4[%c6_190, %c0_191, %c0_192] : memref<8x32x4xbf16, #tpu.memory_space<vmem>>, vector<1x32x4xbf16>
    %248 = vector.shape_cast %247 : vector<1x32x4xbf16> to vector<32x4xbf16>
    %cst_193 = arith.constant dense<0.000000e+00> : vector<16x4xf32>
    %249 = tpu.matmul %18, %248, %cst_193 {dimension_numbers = #tpu.dot_dimension_numbers<[1], [0], [0], [1], [0, 0, 1, 1], [], []>} : vector<16x32xbf16>, vector<32x4xbf16>, vector<16x4xf32> -> vector<16x4xf32>
    %c6_194 = arith.constant 6 : index
    %c0_195 = arith.constant 0 : index
    %250 = vector.load %arg7[%c6_194, %c0_195] : memref<8x4xf32, #tpu.memory_space<vmem>>, vector<1x4xf32>
    %251 = vector.shape_cast %250 : vector<1x4xf32> to vector<4xf32>
    %252 = vector.shape_cast %251 : vector<4xf32> to vector<1x4xf32>
    %253 = vector.broadcast %252 : vector<1x4xf32> to vector<16x4xf32>
    %254 = arith.addf %249, %253 : vector<16x4xf32>
    %255 = arith.truncf %254 : vector<16x4xf32> to vector<16x4xbf16>
    %c0_196 = arith.constant 0 : index
    %c6_197 = arith.constant 6 : index
    %c0_198 = arith.constant 0 : index
    %c0_199 = arith.constant 0 : index
    %256 = vector.load %arg10[%c0_196, %c6_197, %c0_198, %c0_199] : memref<1x8x16x4xbf16, #tpu.memory_space<vmem>>, vector<1x1x16x4xbf16>
    %257 = vector.shape_cast %256 : vector<1x1x16x4xbf16> to vector<16x4xbf16>
    %258 = vector.shape_cast %255 : vector<16x4xbf16> to vector<1x1x16x4xbf16>
    tpu.vector_store %arg10[%c0_196, %c6_197, %c0_198, %c0_199], %258 {strides = array<i32>} : memref<1x8x16x4xbf16, #tpu.memory_space<vmem>>, vector<1x1x16x4xbf16>,
    %c6_200 = arith.constant 6 : index
    %c0_201 = arith.constant 0 : index
    %c0_202 = arith.constant 0 : index
    %259 = vector.load %arg5[%c6_200, %c0_201, %c0_202] : memref<8x32x4xbf16, #tpu.memory_space<vmem>>, vector<1x32x4xbf16>
    %260 = vector.shape_cast %259 : vector<1x32x4xbf16> to vector<32x4xbf16>
    %cst_203 = arith.constant dense<0.000000e+00> : vector<16x4xf32>
    %261 = tpu.matmul %18, %260, %cst_203 {dimension_numbers = #tpu.dot_dimension_numbers<[1], [0], [0], [1], [0, 0, 1, 1], [], []>} : vector<16x32xbf16>, vector<32x4xbf16>, vector<16x4xf32> -> vector<16x4xf32>
    %c6_204 = arith.constant 6 : index
    %c0_205 = arith.constant 0 : index
    %262 = vector.load %arg8[%c6_204, %c0_205] : memref<8x4xf32, #tpu.memory_space<vmem>>, vector<1x4xf32>
    %263 = vector.shape_cast %262 : vector<1x4xf32> to vector<4xf32>
    %264 = vector.shape_cast %263 : vector<4xf32> to vector<1x4xf32>
    %265 = vector.broadcast %264 : vector<1x4xf32> to vector<16x4xf32>
    %266 = arith.addf %261, %265 : vector<16x4xf32>
    %267 = arith.truncf %266 : vector<16x4xf32> to vector<16x4xbf16>
    %c0_206 = arith.constant 0 : index
    %c6_207 = arith.constant 6 : index
    %c0_208 = arith.constant 0 : index
    %c0_209 = arith.constant 0 : index
    %268 = vector.load %arg11[%c0_206, %c6_207, %c0_208, %c0_209] : memref<1x8x16x4xbf16, #tpu.memory_space<vmem>>, vector<1x1x16x4xbf16>
    %269 = vector.shape_cast %268 : vector<1x1x16x4xbf16> to vector<16x4xbf16>
    %270 = vector.shape_cast %267 : vector<16x4xbf16> to vector<1x1x16x4xbf16>
    tpu.vector_store %arg11[%c0_206, %c6_207, %c0_208, %c0_209], %270 {strides = array<i32>} : memref<1x8x16x4xbf16, #tpu.memory_space<vmem>>, vector<1x1x16x4xbf16>,
    %c7 = arith.constant 7 : index
    %c0_210 = arith.constant 0 : index
    %c0_211 = arith.constant 0 : index
    %271 = vector.load %arg3[%c7, %c0_210, %c0_211] : memref<8x32x4xbf16, #tpu.memory_space<vmem>>, vector<1x32x4xbf16>
    %272 = vector.shape_cast %271 : vector<1x32x4xbf16> to vector<32x4xbf16>
    %cst_212 = arith.constant dense<0.000000e+00> : vector<16x4xf32>
    %273 = tpu.matmul %18, %272, %cst_212 {dimension_numbers = #tpu.dot_dimension_numbers<[1], [0], [0], [1], [0, 0, 1, 1], [], []>} : vector<16x32xbf16>, vector<32x4xbf16>, vector<16x4xf32> -> vector<16x4xf32>
    %c7_213 = arith.constant 7 : index
    %c0_214 = arith.constant 0 : index
    %274 = vector.load %arg6[%c7_213, %c0_214] : memref<8x4xf32, #tpu.memory_space<vmem>>, vector<1x4xf32>
    %275 = vector.shape_cast %274 : vector<1x4xf32> to vector<4xf32>
    %276 = vector.shape_cast %275 : vector<4xf32> to vector<1x4xf32>
    %277 = vector.broadcast %276 : vector<1x4xf32> to vector<16x4xf32>
    %278 = arith.addf %273, %277 : vector<16x4xf32>
    %279 = arith.truncf %278 : vector<16x4xf32> to vector<16x4xbf16>
    %c0_215 = arith.constant 0 : index
    %c7_216 = arith.constant 7 : index
    %c0_217 = arith.constant 0 : index
    %c0_218 = arith.constant 0 : index
    %280 = vector.load %arg9[%c0_215, %c7_216, %c0_217, %c0_218] : memref<1x8x16x4xbf16, #tpu.memory_space<vmem>>, vector<1x1x16x4xbf16>
    %281 = vector.shape_cast %280 : vector<1x1x16x4xbf16> to vector<16x4xbf16>
    %282 = vector.shape_cast %279 : vector<16x4xbf16> to vector<1x1x16x4xbf16>
    tpu.vector_store %arg9[%c0_215, %c7_216, %c0_217, %c0_218], %282 {strides = array<i32>} : memref<1x8x16x4xbf16, #tpu.memory_space<vmem>>, vector<1x1x16x4xbf16>,
    %c7_219 = arith.constant 7 : index
    %c0_220 = arith.constant 0 : index
    %c0_221 = arith.constant 0 : index
    %283 = vector.load %arg4[%c7_219, %c0_220, %c0_221] : memref<8x32x4xbf16, #tpu.memory_space<vmem>>, vector<1x32x4xbf16>
    %284 = vector.shape_cast %283 : vector<1x32x4xbf16> to vector<32x4xbf16>
    %cst_222 = arith.constant dense<0.000000e+00> : vector<16x4xf32>
    %285 = tpu.matmul %18, %284, %cst_222 {dimension_numbers = #tpu.dot_dimension_numbers<[1], [0], [0], [1], [0, 0, 1, 1], [], []>} : vector<16x32xbf16>, vector<32x4xbf16>, vector<16x4xf32> -> vector<16x4xf32>
    %c7_223 = arith.constant 7 : index
    %c0_224 = arith.constant 0 : index
    %286 = vector.load %arg7[%c7_223, %c0_224] : memref<8x4xf32, #tpu.memory_space<vmem>>, vector<1x4xf32>
    %287 = vector.shape_cast %286 : vector<1x4xf32> to vector<4xf32>
    %288 = vector.shape_cast %287 : vector<4xf32> to vector<1x4xf32>
    %289 = vector.broadcast %288 : vector<1x4xf32> to vector<16x4xf32>
    %290 = arith.addf %285, %289 : vector<16x4xf32>
    %291 = arith.truncf %290 : vector<16x4xf32> to vector<16x4xbf16>
    %c0_225 = arith.constant 0 : index
    %c7_226 = arith.constant 7 : index
    %c0_227 = arith.constant 0 : index
    %c0_228 = arith.constant 0 : index
    %292 = vector.load %arg10[%c0_225, %c7_226, %c0_227, %c0_228] : memref<1x8x16x4xbf16, #tpu.memory_space<vmem>>, vector<1x1x16x4xbf16>
    %293 = vector.shape_cast %292 : vector<1x1x16x4xbf16> to vector<16x4xbf16>
    %294 = vector.shape_cast %291 : vector<16x4xbf16> to vector<1x1x16x4xbf16>
    tpu.vector_store %arg10[%c0_225, %c7_226, %c0_227, %c0_228], %294 {strides = array<i32>} : memref<1x8x16x4xbf16, #tpu.memory_space<vmem>>, vector<1x1x16x4xbf16>,
    %c7_229 = arith.constant 7 : index
    %c0_230 = arith.constant 0 : index
    %c0_231 = arith.constant 0 : index
    %295 = vector.load %arg5[%c7_229, %c0_230, %c0_231] : memref<8x32x4xbf16, #tpu.memory_space<vmem>>, vector<1x32x4xbf16>
    %296 = vector.shape_cast %295 : vector<1x32x4xbf16> to vector<32x4xbf16>
    %cst_232 = arith.constant dense<0.000000e+00> : vector<16x4xf32>
    %297 = tpu.matmul %18, %296, %cst_232 {dimension_numbers = #tpu.dot_dimension_numbers<[1], [0], [0], [1], [0, 0, 1, 1], [], []>} : vector<16x32xbf16>, vector<32x4xbf16>, vector<16x4xf32> -> vector<16x4xf32>
    %c7_233 = arith.constant 7 : index
    %c0_234 = arith.constant 0 : index
    %298 = vector.load %arg8[%c7_233, %c0_234] : memref<8x4xf32, #tpu.memory_space<vmem>>, vector<1x4xf32>
    %299 = vector.shape_cast %298 : vector<1x4xf32> to vector<4xf32>
    %300 = vector.shape_cast %299 : vector<4xf32> to vector<1x4xf32>
    %301 = vector.broadcast %300 : vector<1x4xf32> to vector<16x4xf32>
    %302 = arith.addf %297, %301 : vector<16x4xf32>
    %303 = arith.truncf %302 : vector<16x4xf32> to vector<16x4xbf16>
    %c0_235 = arith.constant 0 : index
    %c7_236 = arith.constant 7 : index
    %c0_237 = arith.constant 0 : index
    %c0_238 = arith.constant 0 : index
    %304 = vector.load %arg11[%c0_235, %c7_236, %c0_237, %c0_238] : memref<1x8x16x4xbf16, #tpu.memory_space<vmem>>, vector<1x1x16x4xbf16>
    %305 = vector.shape_cast %304 : vector<1x1x16x4xbf16> to vector<16x4xbf16>
    %306 = vector.shape_cast %303 : vector<16x4xbf16> to vector<1x1x16x4xbf16>
    tpu.vector_store %arg11[%c0_235, %c7_236, %c0_237, %c0_238], %306 {strides = array<i32>} : memref<1x8x16x4xbf16, #tpu.memory_space<vmem>>, vector<1x1x16x4xbf16>,
    return
  }
  func.func @transform_0(%arg0: i32, %arg1: i32) -> (i32, i32, i32) {
    %c0_i32 = arith.constant 0 : i32
    %c0_i32_0 = arith.constant 0 : i32
    return %arg0, %arg1, %c0_i32 : i32, i32, i32
  }
  func.func @transform_1(%arg0: i32, %arg1: i32) -> (i32, i32, i32) {
    %c0_i32 = arith.constant 0 : i32
    %c0_i32_0 = arith.constant 0 : i32
    %c0_i32_1 = arith.constant 0 : i32
    %c0_i32_2 = arith.constant 0 : i32
    return %c0_i32, %c0_i32_0, %c0_i32_1 : i32, i32, i32
  }
  func.func @transform_2(%arg0: i32, %arg1: i32) -> (i32, i32, i32) {
    %c0_i32 = arith.constant 0 : i32
    %c0_i32_0 = arith.constant 0 : i32
    %c0_i32_1 = arith.constant 0 : i32
    %c0_i32_2 = arith.constant 0 : i32
    return %c0_i32, %c0_i32_0, %c0_i32_1 : i32, i32, i32
  }
  func.func @transform_3(%arg0: i32, %arg1: i32) -> (i32, i32, i32) {
    %c0_i32 = arith.constant 0 : i32
    %c0_i32_0 = arith.constant 0 : i32
    %c0_i32_1 = arith.constant 0 : i32
    %c0_i32_2 = arith.constant 0 : i32
    return %c0_i32, %c0_i32_0, %c0_i32_1 : i32, i32, i32
  }
  func.func @transform_4(%arg0: i32, %arg1: i32) -> (i32, i32) {
    %c0_i32 = arith.constant 0 : i32
    %c0_i32_0 = arith.constant 0 : i32
    %c0_i32_1 = arith.constant 0 : i32
    return %c0_i32, %c0_i32_0 : i32, i32
  }
  func.func @transform_5(%arg0: i32, %arg1: i32) -> (i32, i32) {
    %c0_i32 = arith.constant 0 : i32
    %c0_i32_0 = arith.constant 0 : i32
    %c0_i32_1 = arith.constant 0 : i32
    return %c0_i32, %c0_i32_0 : i32, i32
  }
  func.func @transform_6(%arg0: i32, %arg1: i32) -> (i32, i32) {
    %c0_i32 = arith.constant 0 : i32
    %c0_i32_0 = arith.constant 0 : i32
    %c0_i32_1 = arith.constant 0 : i32
    return %c0_i32, %c0_i32_0 : i32, i32
  }
  func.func @transform_7(%arg0: i32, %arg1: i32) -> (i32, i32, i32, i32) {
    %c0_i32 = arith.constant 0 : i32
    %c0_i32_0 = arith.constant 0 : i32
    %c0_i32_1 = arith.constant 0 : i32
    return %arg0, %c0_i32, %arg1, %c0_i32_0 : i32, i32, i32, i32
  }
  func.func @transform_8(%arg0: i32, %arg1: i32) -> (i32, i32, i32, i32) {
    %c0_i32 = arith.constant 0 : i32
    %c0_i32_0 = arith.constant 0 : i32
    %c0_i32_1 = arith.constant 0 : i32
    return %arg0, %c0_i32, %arg1, %c0_i32_0 : i32, i32, i32, i32
  }
  func.func @transform_9(%arg0: i32, %arg1: i32) -> (i32, i32, i32, i32) {
    %c0_i32 = arith.constant 0 : i32
    %c0_i32_0 = arith.constant 0 : i32
    %c0_i32_1 = arith.constant 0 : i32
    return %arg0, %c0_i32, %arg1, %c0_i32_0 : i32, i32, i32, i32
  }
}

</mosaic_0001>

<bundles_post_ra>
// kernel: tpu_custom_call.1
= control target key start
LH: loop header
LB: loop body
LE: loop exit
PB: predicated region body
PF: predicated region fallthrough
CT: control target
= control target key end

     0   :  { %s3167_s30 = smov 0   ;;  %s3169_s10 = smov 0   ;;  %s3683_s0 = inlined_call_operand.vmem [shape: f32[2,16,32], index: 0, kind: input, shape index: {}]   ;;  %s3684_s1 = inlined_call_operand.vmem [shape: bf16[8,32,4], index: 1, kind: input, shape index: {}]   ;;  %s3685_s2 = inlined_call_operand.vmem [shape: bf16[8,32,4], index: 2, kind: input, shape index: {}]   ;;  %s3686_s3 = inlined_call_operand.vmem [shape: bf16[8,32,4], index: 3, kind: input, shape index: {}]   ;;  %s3687_s4 = inlined_call_operand.vmem [shape: f32[8,4], index: 4, kind: input, shape index: {}]   ;;  %s3688_s5 = inlined_call_operand.vmem [shape: f32[8,4], index: 5, kind: input, shape index: {}]   ;;  %s3689_s6 = inlined_call_operand.vmem [shape: f32[8,4], index: 6, kind: input, shape index: {}]   ;;  %s3690_s7 = inlined_call_operand.vmem [shape: bf16[2,8,16,4], index: 7, kind: output, shape index: {0}]   ;;  %s3691_s8 = inlined_call_operand.vmem [shape: bf16[2,8,16,4], index: 8, kind: output, shape index: {1}]   ;;  %s3692_s9 = inlined_call_operand.vmem [shape: bf16[2,8,16,4], index: 9, kind: output, shape index: {2}]  }
   0x1   :  { %s3171_s11 = smov 0  }
   0x2 LB: > { %s32_s12 = sadd.s32 1, %s3109_s10  ;;  %p2416_p0 = scmp.ge.s32.totalorder %s3113_s11, 1  ;;  %s3113_s11 = sphi %s3171_s11, %s20_s11   ;;  %s3109_s10 = sphi %s3169_s10, %s3694_s10   ;;  %s3105_s30 = sphi %s3167_s30, %s3693_s30  }
   0x3   : > { %p34_p1 = scmp.ge.s32.totalorder %s32_s12, 2  ;;  %p317_p2 = scmp.lt.s32.totalorder %s3113_s11, 3 }
   0x5   : > { %s3696_s12 = smov (%p34_p1, %s32_s12), 0  ;;  %p318_p3 = pnand %p2416_p0, %p317_p2 }
   0x6   : > { %p380_p4 = scmp.lt.s32.totalorder (!%p318_p3), %s3105_s30, 1 }
   0x7   : > { %321 = sbr.rel (%p318_p3) target bundleno = 616 (0x268), region = 48 }
   0xc   : > { %s3698_s30 = smov (!%p380_p4, %s3105_s30), 1  ;;  %vm422_vm0 = vcmask 261120   ;;  %v3039_v14 = vld [vmem:[%s3684_s1 + $0x8] sm:$0xff]   ;;  %v3115_v16 = vmov 0.0   ;;  %v3041_v17 = vld [vmem:[%s3684_s1] sm:$0xff]   ;;  %vm3116_vm1 = vmmov 0  }
   0xd   : > { %s2697_s13 = sshll.u32 %s3698_s30, 4  ;;  %v3040_v15 = vld [vmem:[%s3685_s2 + $0x8] sm:$0xff]   ;;  %2821 = vmatprep.subr.bf16.mxu0 %v3115_v16  ;;  %2829 = vmatprep.subr.bf16.mxu1 %v3115_v16  ;;  %v3042_v18 = vld [vmem:[%s3685_s2] sm:$0xff]   ;;  %v3044_v30 = vld [vmem:[%s3684_s1 + $0x18] sm:$0xff]   ;;  %s3492_s15 = sshll.u32 %s3698_s30, 6  ;;  %vm524_vm2 = vcmask 27648  }
   0xe   : > { %s387_s16 = scalar_lea.vmem %s3683_s0, %s2697_s13  ;;  %2822 = vmatpush3.bf16.msra.mxu0 %v3039_v14  ;;  %2830 = vmatpush3.bf16.msra.mxu1 %v3040_v15  ;;  %v3043_v29 = vld [vmem:[%s3686_s3 + $0x8] sm:$0xff]   ;;  %v3045_v32 = vld [vmem:[%s3686_s3] sm:$0xff]   ;;  %v3046_v33 = vld [vmem:[%s3684_s1 + $0x10] sm:$0xff]   ;;  %s3498_s18 = scalar_lea.vmem %s3690_s7, %s3492_s15 }
   0xf   : > { %v420_v0 = vld [vmem:[%s387_s16] sm:$0xff]  ;;  %v421_v1 = vld [vmem:[%s387_s16 + $0x8] sm:$0xff]  ;;  %2823 = vmatprep.subr.bf16.mxu0 %v3115_v16  ;;  %2831 = vmatprep.subr.bf16.mxu1 %v3115_v16  ;;  %v3047_v34 = vld [vmem:[%s3685_s2 + $0x18] sm:$0xff]   ;;  %s3504_s21 = scalar_lea.vmem %s3691_s8, %s3492_s15  ;;  %s3524_s27 = scalar_lea.vmem %s3692_s9, %s3492_s15 }
  0x10   : > { %v423_v2 = vsel %vm422_vm0, %v420_v0, 0.0  ;;  %v426_v3 = vsel %vm422_vm0, %v421_v1, 0.0  ;;  %2825 = vmatprep.mubr.msk.bf16.mxu0 %vm3116_vm1, %v3115_v16  ;;  %2833 = vmatprep.mubr.msk.bf16.mxu1 %vm3116_vm1, %v3115_v16  ;;  %v3048_v35 = vld [vmem:[%s3686_s3 + $0x18] sm:$0xff]   ;;  %v3049_v36 = vld [vmem:[%s3685_s2 + $0x10] sm:$0xff]   ;;  %v3051_v38 = vld [vmem:[%s3684_s1 + $0x28] sm:$0xff]  }
  0x11   : > { %424 = vadd.xlane.f32.xlu0 %v423_v2  ;;  %v3050_v37 = vld [vmem:[%s3686_s3 + $0x10] sm:$0xff]   ;;  %v3052_v39 = vld [vmem:[%s3685_s2 + $0x28] sm:$0xff]   ;;  %v3053_v40 = vld [vmem:[%s3684_s1 + $0x20] sm:$0xff]  }
  0x12   : > { %2824 = vmatpush3.bf16.msra.mxu0 %v3041_v17  ;;  %2832 = vmatpush3.bf16.msra.mxu1 %v3042_v18  ;;  %v3054_v41 = vld [vmem:[%s3685_s2 + $0x20] sm:$0xff]   ;;  %v3055_v42 = vld [vmem:[%s3686_s3 + $0x28] sm:$0xff]   ;;  %v3056_v43 = vld [vmem:[%s3684_s1 + $0x38] sm:$0xff]  }
  0x13   : > { %2837 = vmatprep.subr.bf16.mxu0 %v3115_v16  ;;  %2845 = vmatprep.subr.bf16.mxu1 %v3115_v16  ;;  %v3057_v44 = vld [vmem:[%s3686_s3 + $0x20] sm:$0xff]   ;;  %v3058_v45 = vld [vmem:[%s3684_s1 + $0x30] sm:$0xff]   ;;  %v3059_v46 = vld [vmem:[%s3685_s2 + $0x38] sm:$0xff]  }
  0x14   : > { %v3060_v47 = vld [vmem:[%s3686_s3 + $0x38] sm:$0xff]   ;;  %v3061_v48 = vld [vmem:[%s3685_s2 + $0x30] sm:$0xff]   ;;  %v3063_v50 = vld [vmem:[%s3684_s1 + $0x48] sm:$0xff]  }
  0x15   : > { %427 = vadd.xlane.f32.xlu0 %v426_v3  ;;  %v3062_v49 = vld [vmem:[%s3686_s3 + $0x30] sm:$0xff]   ;;  %v3064_v51 = vld [vmem:[%s3685_s2 + $0x48] sm:$0xff]   ;;  %v3065_v52 = vld [vmem:[%s3684_s1 + $0x40] sm:$0xff]  }
  0x16   : > { %v3066_v53 = vld [vmem:[%s3685_s2 + $0x40] sm:$0xff]   ;;  %v3067_v54 = vld [vmem:[%s3686_s3 + $0x48] sm:$0xff]   ;;  %v3068_v55 = vld [vmem:[%s3684_s1 + $0x58] sm:$0xff]  }
  0x17   : > { %v3069_v56 = vld [vmem:[%s3686_s3 + $0x40] sm:$0xff]   ;;  %v3070_v57 = vld [vmem:[%s3684_s1 + $0x50] sm:$0xff]   ;;  %v3071_v58 = vld [vmem:[%s3685_s2 + $0x58] sm:$0xff]  }
  0x18   : > { %v3072_v59 = vld [vmem:[%s3686_s3 + $0x58] sm:$0xff]   ;;  %v3073_v60 = vld [vmem:[%s3685_s2 + $0x50] sm:$0xff]   ;;  %v3075_v62 = vld [vmem:[%s3684_s1 + $0x68] sm:$0xff]  }
  0x19   : > { %v3074_v61 = vld [vmem:[%s3686_s3 + $0x50] sm:$0xff]   ;;  %v3076_v63 = vld [vmem:[%s3685_s2 + $0x68] sm:$0xff]   ;;  %v3080_v3 = vld [vmem:[%s3684_s1 + $0x78] sm:$0xff]  }
  0x1a   : > { %v3079_v2 = vld [vmem:[%s3686_s3 + $0x68] sm:$0xff]  }
  0x9a   : > { %v425_v4 = vpop.xlane.xlu0 %424 }
  0x9b   : > { %v430_v5 = vmul.f32 0.03125, %v425_v4  ;;  %v3081_v4 = vld [vmem:[%s3686_s3 + $0x60] sm:$0xff]  }
  0x9d   : > { %v432_v6 = vsub.f32 %v420_v0, %v430_v5  ;;  %v3077_v0 = vld [vmem:[%s3684_s1 + $0x60] sm:$0xff]   ;;  %v3082_v5 = vld [vmem:[%s3684_s1 + $0x70] sm:$0xff]  }
  0x9e   : > { %v428_v7 = vpop.xlane.xlu0 %427 }
  0x9f   : > { %v431_v8 = vmul.f32 0.03125, %v428_v7  ;;  %v434_v9 = vmul.f32 %v432_v6, %v432_v6  ;;  %v3084_v7 = vld [vmem:[%s3686_s3 + $0x78] sm:$0xff]  }
  0xa1   : > { %v433_v10 = vsub.f32 %v421_v1, %v431_v8  ;;  %v436_v11 = vsel %vm422_vm0, %v434_v9, 0.0  ;;  %v3078_v1 = vld [vmem:[%s3685_s2 + $0x60] sm:$0xff]   ;;  %v3085_v8 = vld [vmem:[%s3685_s2 + $0x70] sm:$0xff]  }
  0xa2   : > { %437 = vadd.xlane.f32.xlu1 %v436_v11  ;;  %v3086_v9 = vld [vmem:[%s3686_s3 + $0x70] sm:$0xff]   ;;  %v2431_v11 = vld [vmem:[%s3688_s5] ss:$0 sm:$0xff] }
  0xa3   : > { %v435_v12 = vmul.f32 %v433_v10, %v433_v10 }
  0xa5   : > { %v439_v13 = vsel %vm422_vm0, %v435_v12, 0.0 }
  0xa6   : > { %440 = vadd.xlane.f32.xlu1 %v439_v13 }
 0x12b   : > { %v438_v19 = vpop.xlane.xlu1 %437 }
 0x12c   : > { %v442_v20 = vmul.f32 0.03125, %v438_v19 }
 0x12e   : > { %v444_v21 = vadd.f32 1e-05, %v442_v20 }
 0x12f   : > { %v441_v22 = vpop.xlane.xlu1 %440 }
 0x130   : > { %v443_v23 = vmul.f32 0.03125, %v441_v22  ;;  %3087 = vrsqrt.f32 %v444_v21 }
 0x132   : > { %v445_v24 = vadd.f32 1e-05, %v443_v23 }
 0x134   : > { %3089 = vrsqrt.f32 %v445_v24 }
 0x13d   : > { %v3088_v25 = vpop.eup %3087 }
 0x13e   : > { %v448_v27 = vmul.f32 %v3088_v25, %v432_v6  ;;  %v3083_v6 = vld [vmem:[%s3685_s2 + $0x78] sm:$0xff]  }
 0x141   : > { %v3090_v26 = vpop.eup %3089 }
 0x142   : > { %v449_v28 = vmul.f32 %v3090_v26, %v433_v10  ;;  %v2425_v10 = vld [vmem:[%s3687_s4] ss:$0 sm:$0xff] }
 0x143   : > { %v2437_v26 = vld [vmem:[%s3689_s6] ss:$0 sm:$0xff] }
 0x144   : > { %v3223_v31 = vpack.c.bf16 %v449_v28, %v448_v27  ;;  %v2447_v27 = vld [vmem:[%s3687_s4 + $0x1] ss:$0 sm:$0xff] }
 0x146   : > { %2826 = vmatmul.mubr.msk.bf16.vlgmr.msra.gmra.mxu0 %vm422_vm0, %v3223_v31  ;;  %2834 = vmatmul.mubr.msk.bf16.vlgmr.msra.gmra.mxu1 %vm422_vm0, %v3223_v31 }
 0x147   : > { %2838 = vmatpush3.bf16.msra.mxu0 %v3043_v29  ;;  %2846 = vmatpush3.bf16.msra.mxu1 %v3044_v30 }
 0x148   : > { %2839 = vmatprep.subr.bf16.mxu0 %v3115_v16  ;;  %2847 = vmatprep.subr.bf16.mxu1 %v3115_v16 }
 0x149   : > { %2841 = vmatprep.mubr.msk.bf16.mxu0 %vm3116_vm1, %v3115_v16  ;;  %2849 = vmatprep.mubr.msk.bf16.mxu1 %vm3116_vm1, %v3115_v16 }
 0x14b   : > { %2840 = vmatpush3.bf16.msra.mxu0 %v3045_v32  ;;  %2848 = vmatpush3.bf16.msra.mxu1 %v3046_v33 }
 0x14c   : > { %2853 = vmatprep.subr.bf16.mxu0 %v3115_v16  ;;  %2861 = vmatprep.subr.bf16.mxu1 %v3115_v16 }
 0x14e   : > { %2842 = vmatmul.mubr.msk.bf16.vlgmr.msra.gmra.mxu0 %vm422_vm0, %v3223_v31  ;;  %2850 = vmatmul.mubr.msk.bf16.vlgmr.msra.gmra.mxu1 %vm422_vm0, %v3223_v31 }
 0x14f   : > { %2854 = vmatpush3.bf16.msra.mxu0 %v3047_v34  ;;  %2862 = vmatpush3.bf16.msra.mxu1 %v3048_v35 }
 0x150   : > { %2855 = vmatprep.subr.bf16.mxu0 %v3115_v16  ;;  %2863 = vmatprep.subr.bf16.mxu1 %v3115_v16 }
 0x151   : > { %2857 = vmatprep.mubr.msk.bf16.mxu0 %vm3116_vm1, %v3115_v16  ;;  %2865 = vmatprep.mubr.msk.bf16.mxu1 %vm3116_vm1, %v3115_v16 }
 0x153   : > { %2856 = vmatpush3.bf16.msra.mxu0 %v3049_v36  ;;  %2864 = vmatpush3.bf16.msra.mxu1 %v3050_v37 }
 0x154   : > { %2869 = vmatprep.subr.bf16.mxu0 %v3115_v16  ;;  %2877 = vmatprep.subr.bf16.mxu1 %v3115_v16 }
 0x156   : > { %2858 = vmatmul.mubr.msk.bf16.vlgmr.msra.gmra.mxu0 %vm422_vm0, %v3223_v31  ;;  %2866 = vmatmul.mubr.msk.bf16.vlgmr.msra.gmra.mxu1 %vm422_vm0, %v3223_v31 }
 0x157   : > { %2870 = vmatpush3.bf16.msra.mxu0 %v3051_v38  ;;  %2878 = vmatpush3.bf16.msra.mxu1 %v3052_v39 }
 0x158   : > { %2871 = vmatprep.subr.bf16.mxu0 %v3115_v16  ;;  %2879 = vmatprep.subr.bf16.mxu1 %v3115_v16 }
 0x159   : > { %2873 = vmatprep.mubr.msk.bf16.mxu0 %vm3116_vm1, %v3115_v16  ;;  %2881 = vmatprep.mubr.msk.bf16.mxu1 %vm3116_vm1, %v3115_v16 }
 0x15b   : > { %2872 = vmatpush3.bf16.msra.mxu0 %v3053_v40  ;;  %2880 = vmatpush3.bf16.msra.mxu1 %v3054_v41 }
 0x15c   : > { %2885 = vmatprep.subr.bf16.mxu0 %v3115_v16  ;;  %2893 = vmatprep.subr.bf16.mxu1 %v3115_v16 }
 0x15e   : > { %2874 = vmatmul.mubr.msk.bf16.vlgmr.msra.gmra.mxu0 %vm422_vm0, %v3223_v31  ;;  %2882 = vmatmul.mubr.msk.bf16.vlgmr.msra.gmra.mxu1 %vm422_vm0, %v3223_v31 }
 0x15f   : > { %2886 = vmatpush3.bf16.msra.mxu0 %v3055_v42  ;;  %2894 = vmatpush3.bf16.msra.mxu1 %v3056_v43 }
 0x160   : > { %2887 = vmatprep.subr.bf16.mxu0 %v3115_v16  ;;  %2895 = vmatprep.subr.bf16.mxu1 %v3115_v16 }
 0x161   : > { %2889 = vmatprep.mubr.msk.bf16.mxu0 %vm3116_vm1, %v3115_v16  ;;  %2897 = vmatprep.mubr.msk.bf16.mxu1 %vm3116_vm1, %v3115_v16 }
 0x163   : > { %2888 = vmatpush3.bf16.msra.mxu0 %v3057_v44  ;;  %2896 = vmatpush3.bf16.msra.mxu1 %v3058_v45  ;;  %v2459_v44 = vld [vmem:[%s3688_s5 + $0x1] ss:$0 sm:$0xff] }
 0x164   : > { %2901 = vmatprep.subr.bf16.mxu0 %v3115_v16  ;;  %2909 = vmatprep.subr.bf16.mxu1 %v3115_v16  ;;  %v2471_v45 = vld [vmem:[%s3689_s6 + $0x1] ss:$0 sm:$0xff] }
 0x166   : > { %2890 = vmatmul.mubr.msk.bf16.vlgmr.msra.gmra.mxu0 %vm422_vm0, %v3223_v31  ;;  %2898 = vmatmul.mubr.msk.bf16.vlgmr.msra.gmra.mxu1 %vm422_vm0, %v3223_v31 }
 0x167   : > { %2902 = vmatpush3.bf16.msra.mxu0 %v3059_v46  ;;  %2910 = vmatpush3.bf16.msra.mxu1 %v3060_v47 }
 0x168   : > { %2903 = vmatprep.subr.bf16.mxu0 %v3115_v16  ;;  %2911 = vmatprep.subr.bf16.mxu1 %v3115_v16 }
 0x169   : > { %2905 = vmatprep.mubr.msk.bf16.mxu0 %vm3116_vm1, %v3115_v16  ;;  %2913 = vmatprep.mubr.msk.bf16.mxu1 %vm3116_vm1, %v3115_v16 }
 0x16b   : > { %2904 = vmatpush3.bf16.msra.mxu0 %v3061_v48  ;;  %2912 = vmatpush3.bf16.msra.mxu1 %v3062_v49 }
 0x16c   : > { %2917 = vmatprep.subr.bf16.mxu0 %v3115_v16  ;;  %2925 = vmatprep.subr.bf16.mxu1 %v3115_v16 }
 0x16e   : > { %2906 = vmatmul.mubr.msk.bf16.vlgmr.msra.gmra.mxu0 %vm422_vm0, %v3223_v31  ;;  %2914 = vmatmul.mubr.msk.bf16.vlgmr.msra.gmra.mxu1 %vm422_vm0, %v3223_v31 }
 0x16f   : > { %2918 = vmatpush3.bf16.msra.mxu0 %v3063_v50  ;;  %2926 = vmatpush3.bf16.msra.mxu1 %v3064_v51 }
 0x170   : > { %2919 = vmatprep.subr.bf16.mxu0 %v3115_v16  ;;  %2927 = vmatprep.subr.bf16.mxu1 %v3115_v16 }
 0x171   : > { %2921 = vmatprep.mubr.msk.bf16.mxu0 %vm3116_vm1, %v3115_v16  ;;  %2929 = vmatprep.mubr.msk.bf16.mxu1 %vm3116_vm1, %v3115_v16 }
 0x173   : > { %2920 = vmatpush3.bf16.msra.mxu0 %v3065_v52  ;;  %2928 = vmatpush3.bf16.msra.mxu1 %v3066_v53 }
 0x174   : > { %2933 = vmatprep.subr.bf16.mxu0 %v3115_v16  ;;  %2941 = vmatprep.subr.bf16.mxu1 %v3115_v16 }
 0x176   : > { %2922 = vmatmul.mubr.msk.bf16.vlgmr.msra.gmra.mxu0 %vm422_vm0, %v3223_v31  ;;  %2930 = vmatmul.mubr.msk.bf16.vlgmr.msra.gmra.mxu1 %vm422_vm0, %v3223_v31 }
 0x177   : > { %2934 = vmatpush3.bf16.msra.mxu0 %v3067_v54  ;;  %2942 = vmatpush3.bf16.msra.mxu1 %v3068_v55 }
 0x178   : > { %2935 = vmatprep.subr.bf16.mxu0 %v3115_v16  ;;  %2943 = vmatprep.subr.bf16.mxu1 %v3115_v16 }
 0x179   : > { %2937 = vmatprep.mubr.msk.bf16.mxu0 %vm3116_vm1, %v3115_v16  ;;  %2945 = vmatprep.mubr.msk.bf16.mxu1 %vm3116_vm1, %v3115_v16 }
 0x17b   : > { %2936 = vmatpush3.bf16.msra.mxu0 %v3069_v56  ;;  %2944 = vmatpush3.bf16.msra.mxu1 %v3070_v57 }
 0x17c   : > { %2949 = vmatprep.subr.bf16.mxu0 %v3115_v16  ;;  %2957 = vmatprep.subr.bf16.mxu1 %v3115_v16 }
 0x17e   : > { %2938 = vmatmul.mubr.msk.bf16.vlgmr.msra.gmra.mxu0 %vm422_vm0, %v3223_v31  ;;  %2946 = vmatmul.mubr.msk.bf16.vlgmr.msra.gmra.mxu1 %vm422_vm0, %v3223_v31 }
 0x17f   : > { %2950 = vmatpush3.bf16.msra.mxu0 %v3071_v58  ;;  %2958 = vmatpush3.bf16.msra.mxu1 %v3072_v59 }
 0x180   : > { %2951 = vmatprep.subr.bf16.mxu0 %v3115_v16  ;;  %2959 = vmatprep.subr.bf16.mxu1 %v3115_v16 }
 0x181   : > { %2953 = vmatprep.mubr.msk.bf16.mxu0 %vm3116_vm1, %v3115_v16  ;;  %2961 = vmatprep.mubr.msk.bf16.mxu1 %vm3116_vm1, %v3115_v16 }
 0x183   : > { %2952 = vmatpush3.bf16.msra.mxu0 %v3073_v60  ;;  %2960 = vmatpush3.bf16.msra.mxu1 %v3074_v61 }
 0x184   : > { %2965 = vmatprep.subr.bf16.mxu0 %v3115_v16  ;;  %2973 = vmatprep.subr.bf16.mxu1 %v3115_v16 }
 0x186   : > { %2954 = vmatmul.mubr.msk.bf16.vlgmr.msra.gmra.mxu0 %vm422_vm0, %v3223_v31  ;;  %2962 = vmatmul.mubr.msk.bf16.vlgmr.msra.gmra.mxu1 %vm422_vm0, %v3223_v31 }
 0x187   : > { %2966 = vmatpush3.bf16.msra.mxu0 %v3075_v62  ;;  %2974 = vmatpush3.bf16.msra.mxu1 %v3076_v63  ;;  %v2483_v62 = vld [vmem:[%s3687_s4 + $0x2] ss:$0 sm:$0xff] }
 0x188   : > { %2967 = vmatprep.subr.bf16.mxu0 %v3115_v16  ;;  %2975 = vmatprep.subr.bf16.mxu1 %v3115_v16  ;;  %v2495_v63 = vld [vmem:[%s3688_s5 + $0x2] ss:$0 sm:$0xff] }
 0x189   : > { %2969 = vmatprep.mubr.msk.bf16.mxu0 %vm3116_vm1, %v3115_v16  ;;  %2977 = vmatprep.mubr.msk.bf16.mxu1 %vm3116_vm1, %v3115_v16 }
 0x18b   : > { %2968 = vmatpush3.bf16.msra.mxu0 %v3077_v0  ;;  %2976 = vmatpush3.bf16.msra.mxu1 %v3078_v1 }
 0x18c   : > { %2981 = vmatprep.subr.bf16.mxu0 %v3115_v16  ;;  %2989 = vmatprep.subr.bf16.mxu1 %v3115_v16 }
 0x18e   : > { %2970 = vmatmul.mubr.msk.bf16.vlgmr.msra.gmra.mxu0 %vm422_vm0, %v3223_v31  ;;  %2978 = vmatmul.mubr.msk.bf16.vlgmr.msra.gmra.mxu1 %vm422_vm0, %v3223_v31 }
 0x18f   : > { %2982 = vmatpush3.bf16.msra.mxu0 %v3079_v2  ;;  %2990 = vmatpush3.bf16.msra.mxu1 %v3080_v3 }
 0x190   : > { %2983 = vmatprep.subr.bf16.mxu0 %v3115_v16  ;;  %2991 = vmatprep.subr.bf16.mxu1 %v3115_v16 }
 0x191   : > { %2985 = vmatprep.mubr.msk.bf16.mxu0 %vm3116_vm1, %v3115_v16  ;;  %2993 = vmatprep.mubr.msk.bf16.mxu1 %vm3116_vm1, %v3115_v16 }
 0x193   : > { %2984 = vmatpush3.bf16.msra.mxu0 %v3081_v4  ;;  %2992 = vmatpush3.bf16.msra.mxu1 %v3082_v5 }
 0x194   : > { %2997 = vmatprep.subr.bf16.mxu0 %v3115_v16  ;;  %3005 = vmatprep.subr.bf16.mxu1 %v3115_v16 }
 0x196   : > { %2986 = vmatmul.mubr.msk.bf16.vlgmr.msra.gmra.mxu0 %vm422_vm0, %v3223_v31  ;;  %2994 = vmatmul.mubr.msk.bf16.vlgmr.msra.gmra.mxu1 %vm422_vm0, %v3223_v31 }
 0x197   : > { %2998 = vmatpush3.bf16.msra.mxu0 %v3083_v6  ;;  %3006 = vmatpush3.bf16.msra.mxu1 %v3084_v7 }
 0x198   : > { %2999 = vmatprep.subr.bf16.mxu0 %v3115_v16  ;;  %3007 = vmatprep.subr.bf16.mxu1 %v3115_v16 }
 0x199   : > { %3001 = vmatprep.mubr.msk.bf16.mxu0 %vm3116_vm1, %v3115_v16  ;;  %3009 = vmatprep.mubr.msk.bf16.mxu1 %vm3116_vm1, %v3115_v16 }
 0x19b   : > { %3000 = vmatpush3.bf16.msra.mxu0 %v3085_v8  ;;  %3008 = vmatpush3.bf16.msra.mxu1 %v3086_v9 }
 0x19e   : > { %3002 = vmatmul.mubr.msk.bf16.vlgmr.msra.gmra.mxu0 %vm422_vm0, %v3223_v31  ;;  %3010 = vmatmul.mubr.msk.bf16.vlgmr.msra.gmra.mxu1 %vm422_vm0, %v3223_v31 }
 0x206   : > { %v509_v12 = vpop.f32.mrf.mxu0  ;;  %v582_v13 = vpop.f32.mrf.mxu1 }
 0x207   : > { %v510_v14 = vadd.f32 %v2425_v10, %v509_v12  ;;  %v583_v15 = vadd.f32 %v2431_v11, %v582_v13 }
 0x208   : > { %v2827_v16 = vpop.f32.mrf.mxu0  ;;  %v2835_v17 = vpop.f32.mrf.mxu1 }
 0x209   : > { %v2701_v18 = vpack.c.bf16 %v510_v14, %v510_v14  ;;  %v2703_v19 = vpack.c.bf16 %v583_v15, %v583_v15  ;;  %v2507_v16 = vld [vmem:[%s3689_s6 + $0x2] ss:$0 sm:$0xff]  ;;  %v2519_v17 = vld [vmem:[%s3687_s4 + $0x3] ss:$0 sm:$0xff] }
 0x20a   : > { %v512_v20 = vpop.f32.mrf.mxu0  ;;  %v585_v21 = vpop.f32.mrf.mxu1 }
 0x20b   : > { %525 = vst.msk [vmem:[%s3498_s18] sm:$0xf] %vm524_vm2, %v2701_v18  ;;  %597 = vst.msk [vmem:[%s3504_s21] sm:$0xf] %vm524_vm2, %v2703_v19  ;;  %v513_v22 = vadd.f32 %v2425_v10, %v512_v20  ;;  %v586_v23 = vadd.f32 %v2431_v11, %v585_v21 }
 0x20c   : > { %v2828_v24 = vpop.f32.mrf.mxu0  ;;  %v2836_v25 = vpop.f32.mrf.mxu1 }
 0x20d   : > { %v2702_v28 = vpack.c.bf16 %v513_v22, %v513_v22  ;;  %v2704_v29 = vpack.c.bf16 %v586_v23, %v586_v23 }
 0x20e   : > { %v654_v30 = vpop.f32.mrf.mxu0  ;;  %v727_v31 = vpop.f32.mrf.mxu1 }
 0x20f   : > { %526 = vst.msk [vmem:[%s3498_s18 + $0x4] sm:$0xf] %vm524_vm2, %v2702_v28  ;;  %598 = vst.msk [vmem:[%s3504_s21 + $0x4] sm:$0xf] %vm524_vm2, %v2704_v29  ;;  %v655_v32 = vadd.f32 %v2437_v26, %v654_v30  ;;  %v728_v33 = vadd.f32 %v2447_v27, %v727_v31 }
 0x210   : > { %v2843_v34 = vpop.f32.mrf.mxu0  ;;  %v2851_v35 = vpop.f32.mrf.mxu1 }
 0x211   : > { %v2705_v36 = vpack.c.bf16 %v655_v32, %v655_v32  ;;  %v2707_v37 = vpack.c.bf16 %v728_v33, %v728_v33  ;;  %v2531_v34 = vld [vmem:[%s3688_s5 + $0x3] ss:$0 sm:$0xff] }
 0x212   : > { %v657_v38 = vpop.f32.mrf.mxu0  ;;  %v730_v39 = vpop.f32.mrf.mxu1  ;;  %v2543_v35 = vld [vmem:[%s3689_s6 + $0x3] ss:$0 sm:$0xff] }
 0x213   : > { %669 = vst.msk [vmem:[%s3524_s27] sm:$0xf] %vm524_vm2, %v2705_v36  ;;  %2453 = vst.msk [vmem:[%s3498_s18 + $0x8] sm:$0xf] %vm524_vm2, %v2707_v37  ;;  %v658_v40 = vadd.f32 %v2437_v26, %v657_v38  ;;  %v731_v41 = vadd.f32 %v2447_v27, %v730_v39 }
 0x214   : > { %v2844_v42 = vpop.f32.mrf.mxu0  ;;  %v2852_v43 = vpop.f32.mrf.mxu1 }
 0x215   : > { %v2706_v46 = vpack.c.bf16 %v658_v40, %v658_v40  ;;  %v2708_v47 = vpack.c.bf16 %v731_v41, %v731_v41 }
 0x216   : > { %v801_v48 = vpop.f32.mrf.mxu0  ;;  %v875_v49 = vpop.f32.mrf.mxu1 }
 0x217   : > { %670 = vst.msk [vmem:[%s3524_s27 + $0x4] sm:$0xf] %vm524_vm2, %v2706_v46  ;;  %2454 = vst.msk [vmem:[%s3498_s18 + $0xc] sm:$0xf] %vm524_vm2, %v2708_v47  ;;  %v802_v50 = vadd.f32 %v2459_v44, %v801_v48  ;;  %v876_v51 = vadd.f32 %v2471_v45, %v875_v49 }
 0x218   : > { %v2859_v52 = vpop.f32.mrf.mxu0  ;;  %v2867_v53 = vpop.f32.mrf.mxu1 }
 0x219   : > { %v2709_v54 = vpack.c.bf16 %v802_v50, %v802_v50  ;;  %v2711_v55 = vpack.c.bf16 %v876_v51, %v876_v51  ;;  %v2555_v52 = vld [vmem:[%s3687_s4 + $0x4] ss:$0 sm:$0xff] }
 0x21a   : > { %v804_v56 = vpop.f32.mrf.mxu0  ;;  %v878_v57 = vpop.f32.mrf.mxu1  ;;  %v2567_v53 = vld [vmem:[%s3688_s5 + $0x4] ss:$0 sm:$0xff] }
 0x21b   : > { %2465 = vst.msk [vmem:[%s3504_s21 + $0x8] sm:$0xf] %vm524_vm2, %v2709_v54  ;;  %2477 = vst.msk [vmem:[%s3524_s27 + $0x8] sm:$0xf] %vm524_vm2, %v2711_v55  ;;  %v805_v58 = vadd.f32 %v2459_v44, %v804_v56  ;;  %v879_v59 = vadd.f32 %v2471_v45, %v878_v57 }
 0x21c   : > { %v2860_v60 = vpop.f32.mrf.mxu0  ;;  %v2868_v61 = vpop.f32.mrf.mxu1 }
 0x21d   : > { %v2710_v0 = vpack.c.bf16 %v805_v58, %v805_v58  ;;  %v2712_v1 = vpack.c.bf16 %v879_v59, %v879_v59 }
 0x21e   : > { %v949_v2 = vpop.f32.mrf.mxu0  ;;  %v1023_v3 = vpop.f32.mrf.mxu1 }
 0x21f   : > { %2466 = vst.msk [vmem:[%s3504_s21 + $0xc] sm:$0xf] %vm524_vm2, %v2710_v0  ;;  %2478 = vst.msk [vmem:[%s3524_s27 + $0xc] sm:$0xf] %vm524_vm2, %v2712_v1  ;;  %v950_v4 = vadd.f32 %v2483_v62, %v949_v2  ;;  %v1024_v5 = vadd.f32 %v2495_v63, %v1023_v3 }
 0x220   : > { %v2875_v6 = vpop.f32.mrf.mxu0  ;;  %v2883_v7 = vpop.f32.mrf.mxu1 }
 0x221   : > { %v2713_v8 = vpack.c.bf16 %v950_v4, %v950_v4  ;;  %v2715_v9 = vpack.c.bf16 %v1024_v5, %v1024_v5  ;;  %v2579_v6 = vld [vmem:[%s3689_s6 + $0x4] ss:$0 sm:$0xff]  ;;  %v2591_v7 = vld [vmem:[%s3687_s4 + $0x5] ss:$0 sm:$0xff] }
 0x222   : > { %v952_v10 = vpop.f32.mrf.mxu0  ;;  %v1026_v11 = vpop.f32.mrf.mxu1 }
 0x223   : > { %2489 = vst.msk [vmem:[%s3498_s18 + $0x10] sm:$0xf] %vm524_vm2, %v2713_v8  ;;  %2501 = vst.msk [vmem:[%s3504_s21 + $0x10] sm:$0xf] %vm524_vm2, %v2715_v9  ;;  %v953_v12 = vadd.f32 %v2483_v62, %v952_v10  ;;  %v1027_v13 = vadd.f32 %v2495_v63, %v1026_v11 }
 0x224   : > { %v2876_v14 = vpop.f32.mrf.mxu0  ;;  %v2884_v15 = vpop.f32.mrf.mxu1 }
 0x225   : > { %v2714_v18 = vpack.c.bf16 %v953_v12, %v953_v12  ;;  %v2716_v19 = vpack.c.bf16 %v1027_v13, %v1027_v13 }
 0x226   : > { %v1097_v20 = vpop.f32.mrf.mxu0  ;;  %v1171_v21 = vpop.f32.mrf.mxu1 }
 0x227   : > { %2490 = vst.msk [vmem:[%s3498_s18 + $0x14] sm:$0xf] %vm524_vm2, %v2714_v18  ;;  %2502 = vst.msk [vmem:[%s3504_s21 + $0x14] sm:$0xf] %vm524_vm2, %v2716_v19  ;;  %v1098_v22 = vadd.f32 %v2507_v16, %v1097_v20  ;;  %v1172_v23 = vadd.f32 %v2519_v17, %v1171_v21 }
 0x228   : > { %v2891_v24 = vpop.f32.mrf.mxu0  ;;  %v2899_v25 = vpop.f32.mrf.mxu1 }
 0x229   : > { %v2717_v26 = vpack.c.bf16 %v1098_v22, %v1098_v22  ;;  %v2719_v27 = vpack.c.bf16 %v1172_v23, %v1172_v23  ;;  %v2603_v24 = vld [vmem:[%s3688_s5 + $0x5] ss:$0 sm:$0xff] }
 0x22a   : > { %v1100_v28 = vpop.f32.mrf.mxu0  ;;  %v1174_v29 = vpop.f32.mrf.mxu1  ;;  %v2615_v25 = vld [vmem:[%s3689_s6 + $0x5] ss:$0 sm:$0xff] }
 0x22b   : > { %2513 = vst.msk [vmem:[%s3524_s27 + $0x10] sm:$0xf] %vm524_vm2, %v2717_v26  ;;  %2525 = vst.msk [vmem:[%s3498_s18 + $0x18] sm:$0xf] %vm524_vm2, %v2719_v27  ;;  %v1101_v30 = vadd.f32 %v2507_v16, %v1100_v28  ;;  %v1175_v31 = vadd.f32 %v2519_v17, %v1174_v29 }
 0x22c   : > { %v2892_v32 = vpop.f32.mrf.mxu0  ;;  %v2900_v33 = vpop.f32.mrf.mxu1 }
 0x22d   : > { %v2718_v36 = vpack.c.bf16 %v1101_v30, %v1101_v30  ;;  %v2720_v37 = vpack.c.bf16 %v1175_v31, %v1175_v31 }
 0x22e   : > { %v1245_v38 = vpop.f32.mrf.mxu0  ;;  %v1319_v39 = vpop.f32.mrf.mxu1 }
 0x22f   : > { %2514 = vst.msk [vmem:[%s3524_s27 + $0x14] sm:$0xf] %vm524_vm2, %v2718_v36  ;;  %2526 = vst.msk [vmem:[%s3498_s18 + $0x1c] sm:$0xf] %vm524_vm2, %v2720_v37  ;;  %v1246_v40 = vadd.f32 %v2531_v34, %v1245_v38  ;;  %v1320_v41 = vadd.f32 %v2543_v35, %v1319_v39 }
 0x230   : > { %v2907_v42 = vpop.f32.mrf.mxu0  ;;  %v2915_v43 = vpop.f32.mrf.mxu1 }
 0x231   : > { %v2721_v44 = vpack.c.bf16 %v1246_v40, %v1246_v40  ;;  %v2723_v45 = vpack.c.bf16 %v1320_v41, %v1320_v41  ;;  %v2627_v42 = vld [vmem:[%s3687_s4 + $0x6] ss:$0 sm:$0xff] }
 0x232   : > { %v1248_v46 = vpop.f32.mrf.mxu0  ;;  %v1322_v47 = vpop.f32.mrf.mxu1  ;;  %v2639_v43 = vld [vmem:[%s3688_s5 + $0x6] ss:$0 sm:$0xff] }
 0x233   : > { %2537 = vst.msk [vmem:[%s3504_s21 + $0x18] sm:$0xf] %vm524_vm2, %v2721_v44  ;;  %2549 = vst.msk [vmem:[%s3524_s27 + $0x18] sm:$0xf] %vm524_vm2, %v2723_v45  ;;  %v1249_v48 = vadd.f32 %v2531_v34, %v1248_v46  ;;  %v1323_v49 = vadd.f32 %v2543_v35, %v1322_v47 }
 0x234   : > { %v2908_v50 = vpop.f32.mrf.mxu0  ;;  %v2916_v51 = vpop.f32.mrf.mxu1 }
 0x235   : > { %v2722_v54 = vpack.c.bf16 %v1249_v48, %v1249_v48  ;;  %v2724_v55 = vpack.c.bf16 %v1323_v49, %v1323_v49 }
 0x236   : > { %v1393_v56 = vpop.f32.mrf.mxu0  ;;  %v1467_v57 = vpop.f32.mrf.mxu1 }
 0x237   : > { %2538 = vst.msk [vmem:[%s3504_s21 + $0x1c] sm:$0xf] %vm524_vm2, %v2722_v54  ;;  %2550 = vst.msk [vmem:[%s3524_s27 + $0x1c] sm:$0xf] %vm524_vm2, %v2724_v55  ;;  %v1394_v58 = vadd.f32 %v2555_v52, %v1393_v56  ;;  %v1468_v59 = vadd.f32 %v2567_v53, %v1467_v57 }
 0x238   : > { %v2923_v60 = vpop.f32.mrf.mxu0  ;;  %v2931_v61 = vpop.f32.mrf.mxu1 }
 0x239   : > { %v2725_v62 = vpack.c.bf16 %v1394_v58, %v1394_v58  ;;  %v2727_v63 = vpack.c.bf16 %v1468_v59, %v1468_v59  ;;  %v2651_v60 = vld [vmem:[%s3689_s6 + $0x6] ss:$0 sm:$0xff]  ;;  %v2663_v61 = vld [vmem:[%s3687_s4 + $0x7] ss:$0 sm:$0xff] }
 0x23a   : > { %v1396_v0 = vpop.f32.mrf.mxu0  ;;  %v1470_v1 = vpop.f32.mrf.mxu1 }
 0x23b   : > { %2561 = vst.msk [vmem:[%s3498_s18 + $0x20] sm:$0xf] %vm524_vm2, %v2725_v62  ;;  %2573 = vst.msk [vmem:[%s3504_s21 + $0x20] sm:$0xf] %vm524_vm2, %v2727_v63  ;;  %v1397_v2 = vadd.f32 %v2555_v52, %v1396_v0  ;;  %v1471_v3 = vadd.f32 %v2567_v53, %v1470_v1 }
 0x23c   : > { %v2924_v4 = vpop.f32.mrf.mxu0  ;;  %v2932_v5 = vpop.f32.mrf.mxu1 }
 0x23d   : > { %v2726_v8 = vpack.c.bf16 %v1397_v2, %v1397_v2  ;;  %v2728_v9 = vpack.c.bf16 %v1471_v3, %v1471_v3 }
 0x23e   : > { %v1541_v10 = vpop.f32.mrf.mxu0  ;;  %v1615_v11 = vpop.f32.mrf.mxu1 }
 0x23f   : > { %2562 = vst.msk [vmem:[%s3498_s18 + $0x24] sm:$0xf] %vm524_vm2, %v2726_v8  ;;  %2574 = vst.msk [vmem:[%s3504_s21 + $0x24] sm:$0xf] %vm524_vm2, %v2728_v9  ;;  %v1542_v12 = vadd.f32 %v2579_v6, %v1541_v10  ;;  %v1616_v13 = vadd.f32 %v2591_v7, %v1615_v11 }
 0x240   : > { %v2939_v14 = vpop.f32.mrf.mxu0  ;;  %v2947_v15 = vpop.f32.mrf.mxu1 }
 0x241   : > { %v2729_v16 = vpack.c.bf16 %v1542_v12, %v1542_v12  ;;  %v2731_v17 = vpack.c.bf16 %v1616_v13, %v1616_v13  ;;  %v2675_v14 = vld [vmem:[%s3688_s5 + $0x7] ss:$0 sm:$0xff] }
 0x242   : > { %v1544_v18 = vpop.f32.mrf.mxu0  ;;  %v1618_v19 = vpop.f32.mrf.mxu1  ;;  %v2687_v15 = vld [vmem:[%s3689_s6 + $0x7] ss:$0 sm:$0xff] }
 0x243   : > { %2585 = vst.msk [vmem:[%s3524_s27 + $0x20] sm:$0xf] %vm524_vm2, %v2729_v16  ;;  %2597 = vst.msk [vmem:[%s3498_s18 + $0x28] sm:$0xf] %vm524_vm2, %v2731_v17  ;;  %v1545_v20 = vadd.f32 %v2579_v6, %v1544_v18  ;;  %v1619_v21 = vadd.f32 %v2591_v7, %v1618_v19 }
 0x244   : > { %v2940_v22 = vpop.f32.mrf.mxu0  ;;  %v2948_v23 = vpop.f32.mrf.mxu1 }
 0x245   : > { %v2730_v26 = vpack.c.bf16 %v1545_v20, %v1545_v20  ;;  %v2732_v27 = vpack.c.bf16 %v1619_v21, %v1619_v21 }
 0x246   : > { %v1689_v28 = vpop.f32.mrf.mxu0  ;;  %v1763_v29 = vpop.f32.mrf.mxu1 }
 0x247   : > { %2586 = vst.msk [vmem:[%s3524_s27 + $0x24] sm:$0xf] %vm524_vm2, %v2730_v26  ;;  %2598 = vst.msk [vmem:[%s3498_s18 + $0x2c] sm:$0xf] %vm524_vm2, %v2732_v27  ;;  %v1690_v30 = vadd.f32 %v2603_v24, %v1689_v28  ;;  %v1764_v31 = vadd.f32 %v2615_v25, %v1763_v29 }
 0x248   : > { %v2955_v32 = vpop.f32.mrf.mxu0  ;;  %v2963_v33 = vpop.f32.mrf.mxu1 }
 0x249   : > { %v2733_v34 = vpack.c.bf16 %v1690_v30, %v1690_v30  ;;  %v2735_v35 = vpack.c.bf16 %v1764_v31, %v1764_v31 }
 0x24a   : > { %v1692_v36 = vpop.f32.mrf.mxu0  ;;  %v1766_v37 = vpop.f32.mrf.mxu1 }
 0x24b   : > { %2609 = vst.msk [vmem:[%s3504_s21 + $0x28] sm:$0xf] %vm524_vm2, %v2733_v34  ;;  %2621 = vst.msk [vmem:[%s3524_s27 + $0x28] sm:$0xf] %vm524_vm2, %v2735_v35  ;;  %v1693_v38 = vadd.f32 %v2603_v24, %v1692_v36  ;;  %v1767_v39 = vadd.f32 %v2615_v25, %v1766_v37 }
 0x24c   : > { %v2956_v40 = vpop.f32.mrf.mxu0  ;;  %v2964_v41 = vpop.f32.mrf.mxu1 }
 0x24d   : > { %v2734_v44 = vpack.c.bf16 %v1693_v38, %v1693_v38  ;;  %v2736_v45 = vpack.c.bf16 %v1767_v39, %v1767_v39 }
 0x24e   : > { %v1837_v46 = vpop.f32.mrf.mxu0  ;;  %v1911_v47 = vpop.f32.mrf.mxu1 }
 0x24f   : > { %2610 = vst.msk [vmem:[%s3504_s21 + $0x2c] sm:$0xf] %vm524_vm2, %v2734_v44  ;;  %2622 = vst.msk [vmem:[%s3524_s27 + $0x2c] sm:$0xf] %vm524_vm2, %v2736_v45  ;;  %v1838_v48 = vadd.f32 %v2627_v42, %v1837_v46  ;;  %v1912_v49 = vadd.f32 %v2639_v43, %v1911_v47 }
 0x250   : > { %v2971_v50 = vpop.f32.mrf.mxu0  ;;  %v2979_v51 = vpop.f32.mrf.mxu1 }
 0x251   : > { %v2737_v52 = vpack.c.bf16 %v1838_v48, %v1838_v48  ;;  %v2739_v53 = vpack.c.bf16 %v1912_v49, %v1912_v49 }
 0x252   : > { %v1840_v54 = vpop.f32.mrf.mxu0  ;;  %v1914_v55 = vpop.f32.mrf.mxu1 }
 0x253   : > { %2633 = vst.msk [vmem:[%s3498_s18 + $0x30] sm:$0xf] %vm524_vm2, %v2737_v52  ;;  %2645 = vst.msk [vmem:[%s3504_s21 + $0x30] sm:$0xf] %vm524_vm2, %v2739_v53  ;;  %v1841_v56 = vadd.f32 %v2627_v42, %v1840_v54  ;;  %v1915_v57 = vadd.f32 %v2639_v43, %v1914_v55 }
 0x254   : > { %v2972_v58 = vpop.f32.mrf.mxu0  ;;  %v2980_v59 = vpop.f32.mrf.mxu1 }
 0x255   : > { %v2738_v62 = vpack.c.bf16 %v1841_v56, %v1841_v56  ;;  %v2740_v63 = vpack.c.bf16 %v1915_v57, %v1915_v57 }
 0x256   : > { %v1985_v0 = vpop.f32.mrf.mxu0  ;;  %v2059_v1 = vpop.f32.mrf.mxu1 }
 0x257   : > { %2634 = vst.msk [vmem:[%s3498_s18 + $0x34] sm:$0xf] %vm524_vm2, %v2738_v62  ;;  %2646 = vst.msk [vmem:[%s3504_s21 + $0x34] sm:$0xf] %vm524_vm2, %v2740_v63  ;;  %v1986_v2 = vadd.f32 %v2651_v60, %v1985_v0  ;;  %v2060_v3 = vadd.f32 %v2663_v61, %v2059_v1 }
 0x258   : > { %v2987_v4 = vpop.f32.mrf.mxu0  ;;  %v2995_v5 = vpop.f32.mrf.mxu1 }
 0x259   : > { %v2741_v6 = vpack.c.bf16 %v1986_v2, %v1986_v2  ;;  %v2743_v7 = vpack.c.bf16 %v2060_v3, %v2060_v3 }
 0x25a   : > { %v1988_v8 = vpop.f32.mrf.mxu0  ;;  %v2062_v9 = vpop.f32.mrf.mxu1 }
 0x25b   : > { %2657 = vst.msk [vmem:[%s3524_s27 + $0x30] sm:$0xf] %vm524_vm2, %v2741_v6  ;;  %2669 = vst.msk [vmem:[%s3498_s18 + $0x38] sm:$0xf] %vm524_vm2, %v2743_v7  ;;  %v1989_v10 = vadd.f32 %v2651_v60, %v1988_v8  ;;  %v2063_v11 = vadd.f32 %v2663_v61, %v2062_v9 }
 0x25c   : > { %v2988_v12 = vpop.f32.mrf.mxu0  ;;  %v2996_v13 = vpop.f32.mrf.mxu1 }
 0x25d   : > { %v2742_v16 = vpack.c.bf16 %v1989_v10, %v1989_v10  ;;  %v2744_v17 = vpack.c.bf16 %v2063_v11, %v2063_v11 }
 0x25e   : > { %v2133_v18 = vpop.f32.mrf.mxu0  ;;  %v2207_v19 = vpop.f32.mrf.mxu1 }
 0x25f   : > { %2658 = vst.msk [vmem:[%s3524_s27 + $0x34] sm:$0xf] %vm524_vm2, %v2742_v16  ;;  %2670 = vst.msk [vmem:[%s3498_s18 + $0x3c] sm:$0xf] %vm524_vm2, %v2744_v17  ;;  %v2134_v20 = vadd.f32 %v2675_v14, %v2133_v18  ;;  %v2208_v21 = vadd.f32 %v2687_v15, %v2207_v19 }
 0x260   : > { %v3003_v22 = vpop.f32.mrf.mxu0  ;;  %v3011_v23 = vpop.f32.mrf.mxu1 }
 0x261   : > { %v2745_v24 = vpack.c.bf16 %v2134_v20, %v2134_v20  ;;  %v2747_v25 = vpack.c.bf16 %v2208_v21, %v2208_v21 }
 0x262   : > { %v2136_v26 = vpop.f32.mrf.mxu0  ;;  %v2210_v27 = vpop.f32.mrf.mxu1 }
 0x263   : > { %2681 = vst.msk [vmem:[%s3504_s21 + $0x38] sm:$0xf] %vm524_vm2, %v2745_v24  ;;  %2693 = vst.msk [vmem:[%s3524_s27 + $0x38] sm:$0xf] %vm524_vm2, %v2747_v25  ;;  %v2137_v28 = vadd.f32 %v2675_v14, %v2136_v26  ;;  %v2211_v29 = vadd.f32 %v2687_v15, %v2210_v27 }
 0x264   : > { %v3004_v30 = vpop.f32.mrf.mxu0  ;;  %v3012_v31 = vpop.f32.mrf.mxu1 }
 0x265   : > { %v2746_v32 = vpack.c.bf16 %v2137_v28, %v2137_v28  ;;  %v2748_v33 = vpack.c.bf16 %v2211_v29, %v2211_v29 }
 0x267   : > { %2682 = vst.msk [vmem:[%s3504_s21 + $0x3c] sm:$0xf] %vm524_vm2, %v2746_v32  ;;  %2694 = vst.msk [vmem:[%s3524_s27 + $0x3c] sm:$0xf] %vm524_vm2, %v2748_v33 }
 0x268 PF: > { %s20_s11 = sadd.s32 1, %s3113_s11   ;;  %s3693_s30 = smov %s3109_s10 }
 0x269   : > { %p17_p5 = scmp.ge.s32.totalorder %s20_s11, 4   ;;  %s3694_s10 = smov %s3696_s12 }
 0x26b   :  { %19 = sbr.rel (!%p17_p5) target bundleno = 2 (0x2), region = 144 }

</bundles_post_ra>
